<compile_context>
chip_gen: v7x
topology: tpu7x:2x2x1
jax: 0.10.0
libtpu: 0.0.40
codegen_flags: <defaults>
</compile_context>

<pallas_src>
import jax
import jax.numpy as jnp
from jax.experimental import pallas as pl
from jax.experimental.pallas import tpu as pltpu


def _round_up(x, m):
    return (x + m - 1) // m * m


def _make_encoder_kernel(batch, tile_b, lat_pad, needs_row_mask):
    def kernel(x_ref, w1_ref, b1_ref, w23_ref, b23_ref, eps_ref, z_ref, kl_ref):
        # ---- layer 1: relu(x @ W1 + b1); bf16 operands, f32 MXU accumulation ----
        h = jnp.dot(x_ref[...], w1_ref[...], preferred_element_type=jnp.float32)
        h = jnp.maximum(h + b1_ref[...], 0.0)                      # (TB, H) f32

        # ---- fused layers 2+3: one (H, 2*Lp) matmul, lane-aligned halves ----
        y = jnp.dot(h.astype(jnp.bfloat16), w23_ref[...],
                    preferred_element_type=jnp.float32) + b23_ref[...]   # (TB, 2*Lp)
        mu = y[:, :lat_pad]                                         # lanes 0..Lp-1
        log_sigma = y[:, lat_pad:]                                  # lanes Lp..2Lp-1
        sigma = jnp.exp(log_sigma)

        # ---- reparameterization (eps padded with zeros in the pad lanes) ----
        z_ref[...] = mu + sigma * eps_ref[...]

        # ---- KL: padding columns (mu=0, lsig=0, sigma=1) contribute exactly 0 ----
        kl = 0.5 * (sigma * sigma + mu * mu) - log_sigma - 0.5      # (TB, Lp)
        if needs_row_mask:
            row = (jax.lax.broadcasted_iota(jnp.int32, (tile_b, 1), 0)
                   + pl.program_id(0) * tile_b)
            kl = jnp.where(row < batch, kl, 0.0)
        kl_ref[0, 0] = jnp.sum(kl)

    return kernel


def variational_encoder_forward(x_nchw, packed_params, eps):
    """x_nchw: (B, 1, 28, 28) f32. packed_params from pack_params(). eps: (B, L) f32.

    Returns (z, kl) with z: (B, L) f32, kl: scalar f32.
    """
    w1, b1, w23, b23 = packed_params
    B = x_nchw.shape[0]
    Kp, H = w1.shape
    two_lp = w23.shape[1]
    Lp = two_lp // 2
    L = eps.shape[1]

    # Batch tiling: multiple of 8, capped at 256; aim for >= 2 tiles when B is large
    # so the parallel batch axis can be split across v7x's two TensorCores.
    TB = min(256, max(8, _round_up(-(-B // 2), 8)))
    B_pad = _round_up(B, TB)
    n_tiles = B_pad // TB

    # Single fused pad of x (batch rows + contraction 784 -> Kp), in bf16.
    x = x_nchw.reshape(B, -1).astype(jnp.bfloat16)
    K = x.shape[1]
    x = jnp.pad(x, ((0, B_pad - B), (0, Kp - K)))
    # Single fused pad of eps (batch rows + latent lanes L -> Lp), stays f32.
    eps_p = jnp.pad(eps, ((0, B_pad - B), (0, Lp - L)))

    kernel = _make_encoder_kernel(B, TB, Lp, needs_row_mask=(B_pad != B))

    cost = pl.CostEstimate(
        flops=2 * B_pad * (Kp * H + H * two_lp),
        transcendentals=B_pad * Lp,
        bytes_accessed=(x.size * 2 + w1.size * 2 + w23.size * 2
                        + b1.size * 4 + b23.size * 4
                        + eps_p.size * 4 + B_pad * Lp * 4 + n_tiles * 4),
    )

    grid_spec = pltpu.PrefetchScalarGridSpec(
        num_scalar_prefetch=0,
        grid=(n_tiles,),
        in_specs=[
            pl.BlockSpec((TB, Kp), lambda i: (i, 0)),               # x bf16 (streamed)
            pl.BlockSpec((Kp, H), lambda i: (0, 0)),                # W1 bf16 (resident)
            pl.BlockSpec((1, H), lambda i: (0, 0)),                 # b1 f32
            pl.BlockSpec((H, two_lp), lambda i: (0, 0)),            # [W2|W3] bf16 (resident)
            pl.BlockSpec((1, two_lp), lambda i: (0, 0)),            # [b2|b3] f32
            pl.BlockSpec((TB, Lp), lambda i: (i, 0)),               # eps f32 (streamed)
        ],
        out_specs=(
            pl.BlockSpec((TB, Lp), lambda i: (i, 0)),               # z (streamed, lane-dense)
            pl.BlockSpec((1, 1), lambda i: (i, 0),
                         memory_space=pltpu.MemorySpace.SMEM),      # per-tile kl scalar
        ),
    )

    z_p, kl_tiles = pl.pallas_call(
        kernel,
        out_shape=(
            jax.ShapeDtypeStruct((B_pad, Lp), jnp.float32),
            jax.ShapeDtypeStruct((n_tiles, 1), jnp.float32),
        ),
        grid_spec=grid_spec,
        compiler_params=pltpu.CompilerParams(
            dimension_semantics=("parallel",)),
        cost_estimate=cost,
    )(x, w1, b1, w23, b23, eps_p)

    return z_p[:B, :L], jnp.sum(kl_tiles)


def init_params(key, latent_dims):
    """PyTorch-nn.Linear-style init (uniform +-1/sqrt(fan_in)), stored transposed (in, out)."""
    k1, k2, k3, k4, k5, k6 = jax.random.split(key, 6)

    def lin(kw, kb, fan_in, fan_out):
        bound = 1.0 / jnp.sqrt(fan_in)
        w = jax.random.uniform(kw, (fan_in, fan_out), jnp.float32, -bound, bound)
        b = jax.random.uniform(kb, (1, fan_out), jnp.float32, -bound, bound)
        return w, b

    w1, b1 = lin(k1, k2, 784, 512)
    w2, b2 = lin(k3, k4, 512, latent_dims)
    w3, b3 = lin(k5, k6, 512, latent_dims)
    return (w1, b1, w2, b2, w3, b3)


def pack_params(params, k_pad=896):
    """bf16 weights; W2/W3 fused with each half zero-padded to 128 lanes; K padded to
    a 128-lane multiple. Biases stay f32 (padded to match)."""
    w1, b1, w2, b2, w3, b3 = params
    k_in = w1.shape[0]
    L = w2.shape[1]
    lat_pad = _round_up(L, 128)

    w1p = jnp.pad(w1, ((0, k_pad - k_in), (0, 0))).astype(jnp.bfloat16)

    w2p = jnp.pad(w2, ((0, 0), (0, lat_pad - L)))
    w3p = jnp.pad(w3, ((0, 0), (0, lat_pad - L)))
    w23 = jnp.concatenate([w2p, w3p], axis=1).astype(jnp.bfloat16)

    b2p = jnp.pad(b2, ((0, 0), (0, lat_pad - L)))
    b3p = jnp.pad(b3, ((0, 0), (0, lat_pad - L)))
    b23 = jnp.concatenate([b2p, b3p], axis=1).astype(jnp.float32)

    return (w1p, b1.astype(jnp.float32), w23, b23)


if __name__ == "__main__":
    key = jax.random.PRNGKey(0)
    k_x, k_p, k_eps = jax.random.split(key, 3)

    B, latent_dims = 8, 32
    x = jax.random.normal(k_x, (B, 1, 28, 28), dtype=jnp.float32)
    eps = jax.random.normal(k_eps, (B, latent_dims), dtype=jnp.float32)

    raw_params = init_params(k_p, latent_dims)
    packed = pack_params(raw_params)

    z, kl = variational_encoder_forward(x, packed, eps)
    jax.block_until_ready((z, kl))

    # Pure-JAX reference using the same bf16-quantized weights and f32 accumulation.
    w1p, b1, w23, b23 = packed
    Lp = w23.shape[1] // 2
    x_flat = x.reshape(B, -1)
    xb = x_flat.astype(jnp.bfloat16).astype(jnp.float32)
    w1f = w1p.astype(jnp.float32)[:784]
    h_ref = jnp.maximum(xb @ w1f + b1, 0.0)
    hb = h_ref.astype(jnp.bfloat16).astype(jnp.float32)
    y_ref = hb @ w23.astype(jnp.float32) + b23
    mu_ref = y_ref[:, :Lp][:, :latent_dims]
    log_sigma_ref = y_ref[:, Lp:][:, :latent_dims]
    sigma_ref = jnp.exp(log_sigma_ref)
    z_ref = mu_ref + sigma_ref * eps
    kl_ref = jnp.sum(0.5 * (sigma_ref ** 2 + mu_ref ** 2) - log_sigma_ref - 0.5)

    assert z.shape == (B, latent_dims)
    assert jnp.allclose(z, z_ref, atol=2e-3, rtol=2e-3), "z mismatch"
    assert jnp.allclose(kl, kl_ref, atol=5e-2, rtol=1e-3), "kl mismatch"

    print("KERNEL_OK")
</pallas_src>

<mosaic_0001>
module attributes {stable_mosaic.version = 11 : i64} {
  func.func @kernel(%arg0: i32, %arg1: memref<8x896xbf16, #tpu.memory_space<vmem>>, %arg2: memref<896x512xbf16, #tpu.memory_space<vmem>>, %arg3: memref<1x512xf32, #tpu.memory_space<vmem>>, %arg4: memref<512x256xbf16, #tpu.memory_space<vmem>>, %arg5: memref<1x256xf32, #tpu.memory_space<vmem>>, %arg6: memref<8x128xf32, #tpu.memory_space<vmem>>, %arg7: memref<8x128xf32, #tpu.memory_space<vmem>>, %arg8: memref<1x1xf32, #tpu.memory_space<smem>>) attributes {dimension_semantics = [#tpu.dimension_semantics<parallel>], iteration_bounds = array<i64: 1>, scalar_prefetch = 0 : i64, scratch_operands = 0 : i64, tpu.core_type = #tpu.core_type<tc>, window_params = [{transform_indices = @transform_0, window_bounds = array<i64: 8, 896>}, {pipeline_mode = #tpu.pipeline_mode<synchronous>, transform_indices = @transform_1, window_bounds = array<i64: 896, 512>}, {pipeline_mode = #tpu.pipeline_mode<synchronous>, transform_indices = @transform_2, window_bounds = array<i64: 1, 512>}, {pipeline_mode = #tpu.pipeline_mode<synchronous>, transform_indices = @transform_3, window_bounds = array<i64: 512, 256>}, {pipeline_mode = #tpu.pipeline_mode<synchronous>, transform_indices = @transform_4, window_bounds = array<i64: 1, 256>}, {transform_indices = @transform_5, window_bounds = array<i64: 8, 128>}, {transform_indices = @transform_6, window_bounds = array<i64: 8, 128>}, {transform_indices = @transform_7, window_bounds = array<i64: 1, 1>}]} {
    %c0 = arith.constant 0 : index
    %c0_0 = arith.constant 0 : index
    %0 = vector.load %arg1[%c0, %c0_0] : memref<8x896xbf16, #tpu.memory_space<vmem>>, vector<8x896xbf16>
    %c0_1 = arith.constant 0 : index
    %c0_2 = arith.constant 0 : index
    %1 = vector.load %arg2[%c0_1, %c0_2] : memref<896x512xbf16, #tpu.memory_space<vmem>>, vector<896x512xbf16>
    %cst = arith.constant dense<0.000000e+00> : vector<8x512xf32>
    %2 = tpu.matmul %0, %1, %cst {dimension_numbers = #tpu.dot_dimension_numbers<[1], [0], [0], [1], [0, 0, 1, 1], [], []>} : vector<8x896xbf16>, vector<896x512xbf16>, vector<8x512xf32> -> vector<8x512xf32>
    %c0_3 = arith.constant 0 : index
    %c0_4 = arith.constant 0 : index
    %3 = vector.load %arg3[%c0_3, %c0_4] : memref<1x512xf32, #tpu.memory_space<vmem>>, vector<1x512xf32>
    %4 = vector.broadcast %3 : vector<1x512xf32> to vector<8x512xf32>
    %5 = arith.addf %2, %4 : vector<8x512xf32>
    %cst_5 = arith.constant 0.000000e+00 : f32
    %6 = vector.broadcast %cst_5 : f32 to vector<8x512xf32>
    %7 = arith.maximumf %5, %6 : vector<8x512xf32>
    %8 = arith.truncf %7 : vector<8x512xf32> to vector<8x512xbf16>
    %c0_6 = arith.constant 0 : index
    %c0_7 = arith.constant 0 : index
    %9 = vector.load %arg4[%c0_6, %c0_7] : memref<512x256xbf16, #tpu.memory_space<vmem>>, vector<512x256xbf16>
    %cst_8 = arith.constant dense<0.000000e+00> : vector<8x256xf32>
    %10 = tpu.matmul %8, %9, %cst_8 {dimension_numbers = #tpu.dot_dimension_numbers<[1], [0], [0], [1], [0, 0, 1, 1], [], []>} : vector<8x512xbf16>, vector<512x256xbf16>, vector<8x256xf32> -> vector<8x256xf32>
    %c0_9 = arith.constant 0 : index
    %c0_10 = arith.constant 0 : index
    %11 = vector.load %arg5[%c0_9, %c0_10] : memref<1x256xf32, #tpu.memory_space<vmem>>, vector<1x256xf32>
    %12 = vector.broadcast %11 : vector<1x256xf32> to vector<8x256xf32>
    %13 = arith.addf %10, %12 : vector<8x256xf32>
    %14 = vector.extract_strided_slice %13 {offsets = [0, 0], sizes = [8, 128], strides = [1, 1]} : vector<8x256xf32> to vector<8x128xf32>
    %15 = vector.extract_strided_slice %13 {offsets = [0, 128], sizes = [8, 128], strides = [1, 1]} : vector<8x256xf32> to vector<8x128xf32>
    %16 = math.exp %15 : vector<8x128xf32>
    %c0_11 = arith.constant 0 : index
    %c0_12 = arith.constant 0 : index
    %17 = vector.load %arg6[%c0_11, %c0_12] : memref<8x128xf32, #tpu.memory_space<vmem>>, vector<8x128xf32>
    %18 = arith.mulf %16, %17 : vector<8x128xf32>
    %19 = arith.addf %14, %18 : vector<8x128xf32>
    %c0_13 = arith.constant 0 : index
    %c0_14 = arith.constant 0 : index
    %20 = vector.load %arg7[%c0_13, %c0_14] : memref<8x128xf32, #tpu.memory_space<vmem>>, vector<8x128xf32>
    tpu.vector_store %arg7[%c0_13, %c0_14], %19 {strides = array<i32>} : memref<8x128xf32, #tpu.memory_space<vmem>>, vector<8x128xf32>,
    %21 = arith.mulf %16, %16 : vector<8x128xf32>
    %22 = arith.mulf %14, %14 : vector<8x128xf32>
    %23 = arith.addf %21, %22 : vector<8x128xf32>
    %cst_15 = arith.constant 5.000000e-01 : f32
    %24 = vector.broadcast %cst_15 : f32 to vector<8x128xf32>
    %25 = arith.mulf %24, %23 : vector<8x128xf32>
    %26 = arith.subf %25, %15 : vector<8x128xf32>
    %cst_16 = arith.constant 5.000000e-01 : f32
    %27 = vector.broadcast %cst_16 : f32 to vector<8x128xf32>
    %28 = arith.subf %26, %27 : vector<8x128xf32>
    %29 = vector.shape_cast %28 : vector<8x128xf32> to vector<1x8x128xf32>
    %cst_17 = arith.constant dense<0.000000e+00> : vector<1xf32>
    %30 = vector.multi_reduction <add>, %29, %cst_17 [1, 2] : vector<1x8x128xf32> to vector<1xf32>
    %31 = vector.shape_cast %30 : vector<1xf32> to vector<1x1x1xf32>
    %32 = vector.extract %31[0, 0, 0] : f32 from vector<1x1x1xf32>
    %c0_18 = arith.constant 0 : index
    %c0_19 = arith.constant 0 : index
    %33 = memref.load %arg8[%c0_18, %c0_19] : memref<1x1xf32, #tpu.memory_space<smem>>
    memref.store %32, %arg8[%c0_18, %c0_19] : memref<1x1xf32, #tpu.memory_space<smem>>
    return
  }
  func.func @transform_0(%arg0: i32) -> (i32, i32) {
    %c0_i32 = arith.constant 0 : i32
    %c0_i32_0 = arith.constant 0 : i32
    return %arg0, %c0_i32 : i32, i32
  }
  func.func @transform_1(%arg0: i32) -> (i32, i32) {
    %c0_i32 = arith.constant 0 : i32
    %c0_i32_0 = arith.constant 0 : i32
    %c0_i32_1 = arith.constant 0 : i32
    return %c0_i32, %c0_i32_0 : i32, i32
  }
  func.func @transform_2(%arg0: i32) -> (i32, i32) {
    %c0_i32 = arith.constant 0 : i32
    %c0_i32_0 = arith.constant 0 : i32
    %c0_i32_1 = arith.constant 0 : i32
    return %c0_i32, %c0_i32_0 : i32, i32
  }
  func.func @transform_3(%arg0: i32) -> (i32, i32) {
    %c0_i32 = arith.constant 0 : i32
    %c0_i32_0 = arith.constant 0 : i32
    %c0_i32_1 = arith.constant 0 : i32
    return %c0_i32, %c0_i32_0 : i32, i32
  }
  func.func @transform_4(%arg0: i32) -> (i32, i32) {
    %c0_i32 = arith.constant 0 : i32
    %c0_i32_0 = arith.constant 0 : i32
    %c0_i32_1 = arith.constant 0 : i32
    return %c0_i32, %c0_i32_0 : i32, i32
  }
  func.func @transform_5(%arg0: i32) -> (i32, i32) {
    %c0_i32 = arith.constant 0 : i32
    %c0_i32_0 = arith.constant 0 : i32
    return %arg0, %c0_i32 : i32, i32
  }
  func.func @transform_6(%arg0: i32) -> (i32, i32) {
    %c0_i32 = arith.constant 0 : i32
    %c0_i32_0 = arith.constant 0 : i32
    return %arg0, %c0_i32 : i32, i32
  }
  func.func @transform_7(%arg0: i32) -> (i32, i32) {
    %c0_i32 = arith.constant 0 : i32
    %c0_i32_0 = arith.constant 0 : i32
    return %arg0, %c0_i32 : i32, i32
  }
}

</mosaic_0001>

<bundles_post_ra>
// kernel: tpu_custom_call.1
= control target key start
LH: loop header
LB: loop body
LE: loop exit
PB: predicated region body
PF: predicated region fallthrough
CT: control target
= control target key end

     0   :  { %13 = vsyncpa [#allocation3], 0  ;;  %s3390_s0 = inlined_call_operand.hbm [shape: bf16[8,896], index: 0, kind: input, shape index: {}]   ;;  %s3391_s1 = inlined_call_operand.hbm [shape: bf16[896,512], index: 1, kind: input, shape index: {}]   ;;  %s3392_s2 = inlined_call_operand.vmem [shape: f32[1,512], index: 2, kind: input, shape index: {}]   ;;  %s3393_s3 = inlined_call_operand.hbm [shape: bf16[512,256], index: 3, kind: input, shape index: {}]   ;;  %s3394_s4 = inlined_call_operand.vmem [shape: f32[1,256], index: 4, kind: input, shape index: {}]   ;;  %s3395_s5 = inlined_call_operand.vmem [shape: f32[8,128], index: 5, kind: input, shape index: {}]   ;;  %s3396_s6 = inlined_call_operand.hbm [shape: f32[8,128], index: 6, kind: output, shape index: {0}]   ;;  %s3397_s7 = inlined_call_operand.hbm [shape: f32[1,1], index: 7, kind: output, shape index: {1}]  }
   0x1   :  { %14 = vsyncpa [#allocation7], 0 }
   0x2   :  { %15 = vsyncpa [#allocation4], 0 }
   0x3   :  { %16 = vsyncpa [#allocation5], 0  ;;  %s3215_s24 = smov [#allocation6]   ;;  %s3109_s28 = scalar_lea.hbm %s3391_s1, 28672 }
   0x4   :  { %s32_s25 = sshll.u32 %s3215_s24, 4  ;;  %p3110_p0 = scmp.ne.s32.totalorder %s3391_s1, %s3109_s28  ;;  %s33_s25 = int_to_ptr.vmem [resolvable:$true] %s32_s25 }
   0x5   :  { %p3113_p1 = scmp.lt.u32.totalorder %s3109_s28, %s3391_s1 }
   0x7   :  { %p3115_p2 = pnand %p3113_p1, %p3110_p0 }
   0x9   :  { %3118 = shalt.err (!%p3115_p2)
}
   0xa   :  { %s3119_s10 = scalar_lea.vmem %s33_s25, 28672  ;;  %p3124_p4 = scmp.lt.s32.totalorder %s33_s25, %s33_s25 }
   0xb   :  { %p3120_p3 = scmp.ne.s32.totalorder %s33_s25, %s3119_s10  ;;  %p3125_p5 = scmp.lt.s32.totalorder %s3119_s10, %s3119_s10 }
   0xd   :  { %p3126_p6 = por %p3125_p5, %p3124_p4 }
   0xf   :  { %p3127_p7 = pnand %p3126_p6, %p3120_p3 }
  0x11   :  { %3130 = shalt.err (!%p3127_p7)
}
  0x12   :  { %s3216_s11 = smov 256   ;;  %s3217_s12 = smov 16  }
  0x13   :  { %38 = dma.hbm_to_vmem [thread:$0]  %s3391_s1, 28672, %s33_s25, [#allocation7], %s3216_s11, %s3216_s11, %s3217_s12  }
  0x14   :  { %s3218_s15 = smov [#allocation2]   ;;  %s3219_s17 = smov [#allocation8]  }
  0x15   :  { %s23_s16 = sshll.u32 %s3218_s15, 4  ;;  %s46_s18 = sshll.u32 %s3219_s17, 4  ;;  %s24_s16 = int_to_ptr.vmem [resolvable:$true] %s23_s16  ;;  %s47_s18 = int_to_ptr.vmem [resolvable:$true] %s46_s18 }
  0x16   :  { %s3131_s21 = scalar_lea.hbm %s3390_s0, 448 }
  0x17   :  { %p3132_p8 = scmp.ne.s32.totalorder %s3390_s0, %s3131_s21  ;;  %p3135_p9 = scmp.lt.u32.totalorder %s3131_s21, %s3390_s0 }
  0x19   :  { %p3137_p10 = pnand %p3135_p9, %p3132_p8 }
  0x1b   :  { %3140 = shalt.err (!%p3137_p10)
}
  0x1c   :  { %s3141_s1 = scalar_lea.vmem %s24_s16, 448  ;;  %p3146_p12 = scmp.lt.s32.totalorder %s24_s16, %s24_s16 }
  0x1d   :  { %p3142_p11 = scmp.ne.s32.totalorder %s24_s16, %s3141_s1  ;;  %p3147_p13 = scmp.lt.s32.totalorder %s3141_s1, %s3141_s1 }
  0x1f   :  { %p3148_p0 = por %p3147_p13, %p3146_p12 }
  0x21   :  { %p3149_p1 = pnand %p3148_p0, %p3142_p11 }
  0x23   :  { %3152 = shalt.err (!%p3149_p1)
}
  0x24   :  { %26 = dma.hbm_to_vmem [thread:$0]  %s3390_s0, 448, %s24_s16, [#allocation3]  }
  0x25   :  { %s3153_s30 = scalar_lea.hbm %s3393_s3, 8192 }
  0x26   :  { %p3154_p2 = scmp.ne.s32.totalorder %s3393_s3, %s3153_s30  ;;  %p3157_p3 = scmp.lt.u32.totalorder %s3153_s30, %s3393_s3 }
  0x28   :  { %p3159_p4 = pnand %p3157_p3, %p3154_p2 }
  0x2a   :  { %3162 = shalt.err (!%p3159_p4)
}
  0x2b   :  { %s3163_s12 = scalar_lea.vmem %s47_s18, 8192  ;;  %p3168_p6 = scmp.lt.s32.totalorder %s47_s18, %s47_s18 }
  0x2c   :  { %p3164_p5 = scmp.ne.s32.totalorder %s47_s18, %s3163_s12  ;;  %p3169_p7 = scmp.lt.s32.totalorder %s3163_s12, %s3163_s12 }
  0x2e   :  { %p3170_p8 = por %p3169_p7, %p3168_p6 }
  0x30   :  { %p3171_p9 = pnand %p3170_p8, %p3164_p5 }
  0x32   :  { %3174 = shalt.err (!%p3171_p9)
}
  0x33   :  { %s3220_s0 = smov 128   ;;  %s3221_s13 = smov 8  }
  0x34   :  { %52 = dma.hbm_to_vmem [thread:$0]  %s3393_s3, 8192, %s47_s18, [#allocation7], %s3220_s0, %s3220_s0, %s3221_s13  }
  0x35   :  { %3207 = dma.done.wait [#allocation3], 448  }
  0x36   :  { %3208 = vsyncadd [#allocation3], 4294966848 }
  0x37   :  { %3209 = dma.done.wait [#allocation7], 36864  }
  0x38   :  { %3210 = vsyncadd [#allocation7], 4294930432  ;;  %v2668_v0 = vld [vmem:[#allocation6 + $0x4] ss:$16 sps:$4 sm:$0xff]   ;;  %v2672_v2 = vld [vmem:[#allocation6] ss:$16 sps:$4 sm:$0xff]  }
  0x39   :  { %v2670_v1 = vld [vmem:[#allocation6 + $0x204] ss:$16 sps:$4 sm:$0xff]   ;;  %1462 = vmatprep.subr.bf16.mxu1 %v2668_v0  ;;  %v2673_v3 = vld [vmem:[#allocation6 + $0x200] ss:$16 sps:$4 sm:$0xff]  }
  0x3a   :  { %1503 = vmatprep.subr.bf16.mxu0 %v2670_v1  ;;  %v2674_v4 = vld [vmem:[#allocation6 + $0x24] ss:$16 sps:$4 sm:$0xff]   ;;  %1463 = vmatpush1.bf16.msra.mxu1 %v2672_v2  ;;  %v2678_v6 = vld [vmem:[#allocation6 + $0x20] ss:$16 sps:$4 sm:$0xff]  }
  0x3b   :  { %1504 = vmatpush1.bf16.msra.mxu0 %v2673_v3  ;;  %v2676_v5 = vld [vmem:[#allocation6 + $0x224] ss:$16 sps:$4 sm:$0xff]   ;;  %1464 = vmatprep.subr.bf16.mxu1 %v2674_v4  ;;  %v2679_v7 = vld [vmem:[#allocation6 + $0x220] ss:$16 sps:$4 sm:$0xff]  }
  0x3c   :  { %1505 = vmatprep.subr.bf16.mxu0 %v2676_v5  ;;  %v2680_v8 = vld [vmem:[#allocation6 + $0x44] ss:$16 sps:$4 sm:$0xff]   ;;  %v2684_v10 = vld [vmem:[#allocation6 + $0x40] ss:$16 sps:$4 sm:$0xff]   ;;  %v2773_v5 = vld [vmem:[#allocation6 + $0xc] ss:$16 sps:$4 sm:$0xff]  }
  0x3d   :  { %v2682_v9 = vld [vmem:[#allocation6 + $0x244] ss:$16 sps:$4 sm:$0xff]   ;;  %v2685_v11 = vld [vmem:[#allocation6 + $0x240] ss:$16 sps:$4 sm:$0xff]  }
  0x3e   :  { %1465 = vmatpush1.bf16.msra.mxu1 %v2678_v6  ;;  %v2686_v12 = vld [vmem:[#allocation6 + $0x64] ss:$16 sps:$4 sm:$0xff]   ;;  %v2690_v14 = vld [vmem:[#allocation6 + $0x60] ss:$16 sps:$4 sm:$0xff]  }
  0x3f   :  { %1506 = vmatpush1.bf16.msra.mxu0 %v2679_v7  ;;  %1466 = vmatprep.subr.bf16.mxu1 %v2680_v8  ;;  %v2688_v13 = vld [vmem:[#allocation6 + $0x264] ss:$16 sps:$4 sm:$0xff]   ;;  %v2691_v15 = vld [vmem:[#allocation6 + $0x260] ss:$16 sps:$4 sm:$0xff]  }
  0x40   :  { %1507 = vmatprep.subr.bf16.mxu0 %v2682_v9  ;;  %v2692_v16 = vld [vmem:[#allocation6 + $0x84] ss:$16 sps:$4 sm:$0xff]   ;;  %v2696_v18 = vld [vmem:[#allocation6 + $0x80] ss:$16 sps:$4 sm:$0xff]   ;;  %v2771_v9 = vld [vmem:[#allocation6 + $0x8] ss:$16 sps:$4 sm:$0xff]  }
  0x41   :  { %v2694_v17 = vld [vmem:[#allocation6 + $0x284] ss:$16 sps:$4 sm:$0xff]   ;;  %v2697_v19 = vld [vmem:[#allocation6 + $0x280] ss:$16 sps:$4 sm:$0xff]  }
  0x42   :  { %1467 = vmatpush1.bf16.msra.mxu1 %v2684_v10  ;;  %v2698_v20 = vld [vmem:[#allocation6 + $0xa4] ss:$16 sps:$4 sm:$0xff]   ;;  %v2702_v22 = vld [vmem:[#allocation6 + $0xa0] ss:$16 sps:$4 sm:$0xff]  }
  0x43   :  { %1508 = vmatpush1.bf16.msra.mxu0 %v2685_v11  ;;  %1468 = vmatprep.subr.bf16.mxu1 %v2686_v12  ;;  %v2700_v21 = vld [vmem:[#allocation6 + $0x2a4] ss:$16 sps:$4 sm:$0xff]   ;;  %v2703_v23 = vld [vmem:[#allocation6 + $0x2a0] ss:$16 sps:$4 sm:$0xff]   ;;  %v2779_v11 = vld [vmem:[#allocation6 + $0x2c] ss:$16 sps:$4 sm:$0xff]  }
  0x44   :  { %1509 = vmatprep.subr.bf16.mxu0 %v2688_v13  ;;  %v2704_v24 = vld [vmem:[#allocation6 + $0xc4] ss:$16 sps:$4 sm:$0xff]   ;;  %v2708_v26 = vld [vmem:[#allocation6 + $0xc0] ss:$16 sps:$4 sm:$0xff]   ;;  %v2777_v13 = vld [vmem:[#allocation6 + $0x28] ss:$16 sps:$4 sm:$0xff]  }
  0x45   :  { %v2706_v25 = vld [vmem:[#allocation6 + $0x2c4] ss:$16 sps:$4 sm:$0xff]   ;;  %v2709_v27 = vld [vmem:[#allocation6 + $0x2c0] ss:$16 sps:$4 sm:$0xff]  }
  0x46   :  { %1469 = vmatpush1.bf16.msra.mxu1 %v2690_v14  ;;  %v2710_v28 = vld [vmem:[#allocation6 + $0xe4] ss:$16 sps:$4 sm:$0xff]   ;;  %v2714_v30 = vld [vmem:[#allocation6 + $0xe0] ss:$16 sps:$4 sm:$0xff]  }
  0x47   :  { %1510 = vmatpush1.bf16.msra.mxu0 %v2691_v15  ;;  %1470 = vmatprep.subr.bf16.mxu1 %v2692_v16  ;;  %v2712_v29 = vld [vmem:[#allocation6 + $0x2e4] ss:$16 sps:$4 sm:$0xff]   ;;  %v2715_v31 = vld [vmem:[#allocation6 + $0x2e0] ss:$16 sps:$4 sm:$0xff]   ;;  %v2785_v15 = vld [vmem:[#allocation6 + $0x4c] ss:$16 sps:$4 sm:$0xff]  }
  0x48   :  { %1511 = vmatprep.subr.bf16.mxu0 %v2694_v17  ;;  %v2716_v32 = vld [vmem:[#allocation6 + $0x104] ss:$16 sps:$4 sm:$0xff]   ;;  %v2720_v34 = vld [vmem:[#allocation6 + $0x100] ss:$16 sps:$4 sm:$0xff]   ;;  %v2783_v17 = vld [vmem:[#allocation6 + $0x48] ss:$16 sps:$4 sm:$0xff]  }
  0x49   :  { %v2718_v33 = vld [vmem:[#allocation6 + $0x304] ss:$16 sps:$4 sm:$0xff]   ;;  %v2721_v35 = vld [vmem:[#allocation6 + $0x300] ss:$16 sps:$4 sm:$0xff]  }
  0x4a   :  { %1471 = vmatpush1.bf16.msra.mxu1 %v2696_v18  ;;  %v2722_v36 = vld [vmem:[#allocation6 + $0x124] ss:$16 sps:$4 sm:$0xff]   ;;  %v2726_v38 = vld [vmem:[#allocation6 + $0x120] ss:$16 sps:$4 sm:$0xff]  }
  0x4b   :  { %1512 = vmatpush1.bf16.msra.mxu0 %v2697_v19  ;;  %1472 = vmatprep.subr.bf16.mxu1 %v2698_v20  ;;  %v2724_v37 = vld [vmem:[#allocation6 + $0x324] ss:$16 sps:$4 sm:$0xff]   ;;  %v2727_v39 = vld [vmem:[#allocation6 + $0x320] ss:$16 sps:$4 sm:$0xff]   ;;  %v2791_v19 = vld [vmem:[#allocation6 + $0x6c] ss:$16 sps:$4 sm:$0xff]  }
  0x4c   :  { %1513 = vmatprep.subr.bf16.mxu0 %v2700_v21  ;;  %v2728_v40 = vld [vmem:[#allocation6 + $0x144] ss:$16 sps:$4 sm:$0xff]   ;;  %v2732_v42 = vld [vmem:[#allocation6 + $0x140] ss:$16 sps:$4 sm:$0xff]   ;;  %v2789_v21 = vld [vmem:[#allocation6 + $0x68] ss:$16 sps:$4 sm:$0xff]  }
  0x4d   :  { %v2730_v41 = vld [vmem:[#allocation6 + $0x344] ss:$16 sps:$4 sm:$0xff]   ;;  %v2733_v43 = vld [vmem:[#allocation6 + $0x340] ss:$16 sps:$4 sm:$0xff]  }
  0x4e   :  { %1473 = vmatpush1.bf16.msra.mxu1 %v2702_v22  ;;  %v2734_v44 = vld [vmem:[#allocation6 + $0x164] ss:$16 sps:$4 sm:$0xff]   ;;  %v68_v48 = vld [vmem:[#allocation2 + $0x8] sm:$0xff] }
  0x4f   :  { %1514 = vmatpush1.bf16.msra.mxu0 %v2703_v23  ;;  %1474 = vmatprep.subr.bf16.mxu1 %v2704_v24  ;;  %v2736_v45 = vld [vmem:[#allocation6 + $0x364] ss:$16 sps:$4 sm:$0xff]   ;;  %v2738_v49 = vld [vmem:[#allocation6 + $0x160] ss:$16 sps:$4 sm:$0xff]   ;;  %v3303_v51 = vcombine.high %v68_v48, %v68_v48  ;;  %v3309_v7 = vcombine.low %v68_v48, %v68_v48  ;;  %v2797_v23 = vld [vmem:[#allocation6 + $0x8c] ss:$16 sps:$4 sm:$0xff]  }
  0x50   :  { %1515 = vmatprep.subr.bf16.mxu0 %v2706_v25  ;;  %v67_v46 = vld [vmem:[#allocation2] sm:$0xff]  ;;  %v2739_v50 = vld [vmem:[#allocation6 + $0x360] ss:$16 sps:$4 sm:$0xff]  }
  0x51   :  { %v3301_v47 = vcombine.high %v67_v46, %v67_v46  ;;  %v2740_v52 = vld [vmem:[#allocation6 + $0x184] ss:$16 sps:$4 sm:$0xff]   ;;  %1535 = vmatprep.mubr.bf16.mxu0 %v3303_v51  ;;  %v2744_v54 = vld [vmem:[#allocation6 + $0x180] ss:$16 sps:$4 sm:$0xff]   ;;  %v3307_v6 = vcombine.low %v67_v46, %v67_v46  ;;  %v2795_v25 = vld [vmem:[#allocation6 + $0x88] ss:$16 sps:$4 sm:$0xff]  }
  0x52   :  { %1475 = vmatpush1.bf16.msra.mxu1 %v2708_v26  ;;  %v2742_v53 = vld [vmem:[#allocation6 + $0x384] ss:$16 sps:$4 sm:$0xff]   ;;  %v2745_v55 = vld [vmem:[#allocation6 + $0x380] ss:$16 sps:$4 sm:$0xff]  }
  0x53   :  { %1516 = vmatpush1.bf16.msra.mxu0 %v2709_v27  ;;  %1476 = vmatprep.subr.bf16.mxu1 %v2710_v28  ;;  %v2746_v56 = vld [vmem:[#allocation6 + $0x1a4] ss:$16 sps:$4 sm:$0xff]   ;;  %v2750_v58 = vld [vmem:[#allocation6 + $0x1a0] ss:$16 sps:$4 sm:$0xff]   ;;  %v2803_v27 = vld [vmem:[#allocation6 + $0xac] ss:$16 sps:$4 sm:$0xff]  }
  0x54   :  { %1517 = vmatprep.subr.bf16.mxu0 %v2712_v29  ;;  %1494 = vmatprep.mubr.bf16.mxu1 %v3301_v47  ;;  %v2748_v57 = vld [vmem:[#allocation6 + $0x3a4] ss:$16 sps:$4 sm:$0xff]   ;;  %v2751_v59 = vld [vmem:[#allocation6 + $0x3a0] ss:$16 sps:$4 sm:$0xff]   ;;  %v2801_v29 = vld [vmem:[#allocation6 + $0xa8] ss:$16 sps:$4 sm:$0xff]  }
  0x55   :  { %v2752_v60 = vld [vmem:[#allocation6 + $0x1c4] ss:$16 sps:$4 sm:$0xff]   ;;  %v2756_v62 = vld [vmem:[#allocation6 + $0x1c0] ss:$16 sps:$4 sm:$0xff]  }
  0x56   :  { %1477 = vmatpush1.bf16.msra.mxu1 %v2714_v30  ;;  %v2754_v61 = vld [vmem:[#allocation6 + $0x3c4] ss:$16 sps:$4 sm:$0xff]   ;;  %v2757_v63 = vld [vmem:[#allocation6 + $0x3c0] ss:$16 sps:$4 sm:$0xff]  }
  0x57   :  { %1518 = vmatpush1.bf16.msra.mxu0 %v2715_v31  ;;  %1478 = vmatprep.subr.bf16.mxu1 %v2716_v32  ;;  %v2758_v0 = vld [vmem:[#allocation6 + $0x1e4] ss:$16 sps:$4 sm:$0xff]   ;;  %v2762_v2 = vld [vmem:[#allocation6 + $0x1e0] ss:$16 sps:$4 sm:$0xff]   ;;  %v2809_v31 = vld [vmem:[#allocation6 + $0xcc] ss:$16 sps:$4 sm:$0xff]  }
  0x58   :  { %1519 = vmatprep.subr.bf16.mxu0 %v2718_v33  ;;  %v2760_v1 = vld [vmem:[#allocation6 + $0x3e4] ss:$16 sps:$4 sm:$0xff]   ;;  %v2763_v3 = vld [vmem:[#allocation6 + $0x3e0] ss:$16 sps:$4 sm:$0xff]  }
  0x59   :  { %v2770_v4 = vld [vmem:[#allocation6 + $0x404] ss:$16 sps:$4 sm:$0xff]   ;;  %v2768_v8 = vld [vmem:[#allocation6 + $0x400] ss:$16 sps:$4 sm:$0xff]  }
  0x5a   :  { %1479 = vmatpush1.bf16.msra.mxu1 %v2720_v34  ;;  %v2776_v10 = vld [vmem:[#allocation6 + $0x424] ss:$16 sps:$4 sm:$0xff]   ;;  %v2774_v12 = vld [vmem:[#allocation6 + $0x420] ss:$16 sps:$4 sm:$0xff]  }
  0x5b   :  { %1520 = vmatpush1.bf16.msra.mxu0 %v2721_v35  ;;  %1480 = vmatprep.subr.bf16.mxu1 %v2722_v36  ;;  %v2782_v14 = vld [vmem:[#allocation6 + $0x444] ss:$16 sps:$4 sm:$0xff]   ;;  %v2780_v16 = vld [vmem:[#allocation6 + $0x440] ss:$16 sps:$4 sm:$0xff]   ;;  %v2807_v35 = vld [vmem:[#allocation6 + $0xc8] ss:$16 sps:$4 sm:$0xff]  }
  0x5c   :  { %1521 = vmatprep.subr.bf16.mxu0 %v2724_v37  ;;  %v2788_v18 = vld [vmem:[#allocation6 + $0x464] ss:$16 sps:$4 sm:$0xff]   ;;  %v2786_v20 = vld [vmem:[#allocation6 + $0x460] ss:$16 sps:$4 sm:$0xff]   ;;  %v2815_v37 = vld [vmem:[#allocation6 + $0xec] ss:$16 sps:$4 sm:$0xff]  }
  0x5d   :  { %v2794_v22 = vld [vmem:[#allocation6 + $0x484] ss:$16 sps:$4 sm:$0xff]   ;;  %v2792_v24 = vld [vmem:[#allocation6 + $0x480] ss:$16 sps:$4 sm:$0xff]  }
  0x5e   :  { %1481 = vmatpush1.bf16.msra.mxu1 %v2726_v38  ;;  %v2800_v26 = vld [vmem:[#allocation6 + $0x4a4] ss:$16 sps:$4 sm:$0xff]   ;;  %v2798_v28 = vld [vmem:[#allocation6 + $0x4a0] ss:$16 sps:$4 sm:$0xff]  }
  0x5f   :  { %1522 = vmatpush1.bf16.msra.mxu0 %v2727_v39  ;;  %1482 = vmatprep.subr.bf16.mxu1 %v2728_v40  ;;  %v2806_v30 = vld [vmem:[#allocation6 + $0x4c4] ss:$16 sps:$4 sm:$0xff]   ;;  %v2804_v33 = vld [vmem:[#allocation6 + $0x4c0] ss:$16 sps:$4 sm:$0xff]   ;;  %v2813_v39 = vld [vmem:[#allocation6 + $0xe8] ss:$16 sps:$4 sm:$0xff]  }
  0x60   :  { %1523 = vmatprep.subr.bf16.mxu0 %v2730_v41  ;;  %v3314_v32 = vld [vmem:[#allocation2 + $0x10] sm:$0xff]  ;;  %v2810_v38 = vld [vmem:[#allocation6 + $0x4e0] ss:$16 sps:$4 sm:$0xff]   ;;  %v2821_v41 = vld [vmem:[#allocation6 + $0x10c] ss:$16 sps:$4 sm:$0xff]  }
  0x61   :  { %v3318_v34 = vcombine.high %v3314_v32, %v3314_v32  ;;  %v2812_v36 = vld [vmem:[#allocation6 + $0x4e4] ss:$16 sps:$4 sm:$0xff]   ;;  %v2822_v46 = vld [vmem:[#allocation6 + $0x520] ss:$16 sps:$4 sm:$0xff]  }
  0x62   :  { %1483 = vmatpush1.bf16.msra.mxu1 %v2732_v42  ;;  %v2818_v40 = vld [vmem:[#allocation6 + $0x504] ss:$16 sps:$4 sm:$0xff]   ;;  %v2816_v42 = vld [vmem:[#allocation6 + $0x500] ss:$16 sps:$4 sm:$0xff]  }
  0x63   :  { %1524 = vmatpush1.bf16.msra.mxu0 %v2733_v43  ;;  %1484 = vmatprep.subr.bf16.mxu1 %v2734_v44  ;;  %v2819_v43 = vld [vmem:[#allocation6 + $0x108] ss:$16 sps:$4 sm:$0xff]   ;;  %v2824_v44 = vld [vmem:[#allocation6 + $0x524] ss:$16 sps:$4 sm:$0xff]  }
  0x64   :  { %1525 = vmatprep.subr.bf16.mxu0 %v2736_v45  ;;  %v2827_v45 = vld [vmem:[#allocation6 + $0x12c] ss:$16 sps:$4 sm:$0xff]   ;;  %v2830_v48 = vld [vmem:[#allocation6 + $0x544] ss:$16 sps:$4 sm:$0xff]  }
  0x66   :  { %1485 = vmatpush1.bf16.msra.mxu1 %v2738_v49  ;;  %v2833_v49 = vld [vmem:[#allocation6 + $0x14c] ss:$16 sps:$4 sm:$0xff]  }
  0x67   :  { %1526 = vmatpush1.bf16.msra.mxu0 %v2739_v50  ;;  %1486 = vmatprep.subr.bf16.mxu1 %v2740_v52  ;;  %v2828_v50 = vld [vmem:[#allocation6 + $0x540] ss:$16 sps:$4 sm:$0xff]   ;;  %v2831_v52 = vld [vmem:[#allocation6 + $0x148] ss:$16 sps:$4 sm:$0xff]  }
  0x68   :  { %1527 = vmatprep.subr.bf16.mxu0 %v2742_v53  ;;  %v2836_v53 = vld [vmem:[#allocation6 + $0x564] ss:$16 sps:$4 sm:$0xff]  }
  0x6a   :  { %1487 = vmatpush1.bf16.msra.mxu1 %v2744_v54  ;;  %v2839_v54 = vld [vmem:[#allocation6 + $0x16c] ss:$16 sps:$4 sm:$0xff]  }
  0x6b   :  { %1528 = vmatpush1.bf16.msra.mxu0 %v2745_v55  ;;  %1488 = vmatprep.subr.bf16.mxu1 %v2746_v56  ;;  %v2834_v55 = vld [vmem:[#allocation6 + $0x560] ss:$16 sps:$4 sm:$0xff]   ;;  %v2837_v56 = vld [vmem:[#allocation6 + $0x168] ss:$16 sps:$4 sm:$0xff]  }
  0x6c   :  { %1529 = vmatprep.subr.bf16.mxu0 %v2748_v57  ;;  %v2842_v57 = vld [vmem:[#allocation6 + $0x584] ss:$16 sps:$4 sm:$0xff]  }
  0x6e   :  { %1489 = vmatpush1.bf16.msra.mxu1 %v2750_v58  ;;  %v2845_v58 = vld [vmem:[#allocation6 + $0x18c] ss:$16 sps:$4 sm:$0xff]  }
  0x6f   :  { %1530 = vmatpush1.bf16.msra.mxu0 %v2751_v59  ;;  %1490 = vmatprep.subr.bf16.mxu1 %v2752_v60  ;;  %v2840_v59 = vld [vmem:[#allocation6 + $0x580] ss:$16 sps:$4 sm:$0xff]   ;;  %v2843_v60 = vld [vmem:[#allocation6 + $0x188] ss:$16 sps:$4 sm:$0xff]  }
  0x70   :  { %1531 = vmatprep.subr.bf16.mxu0 %v2754_v61  ;;  %v2848_v61 = vld [vmem:[#allocation6 + $0x5a4] ss:$16 sps:$4 sm:$0xff]  }
  0x72   :  { %1491 = vmatpush1.bf16.msra.mxu1 %v2756_v62  ;;  %v2851_v62 = vld [vmem:[#allocation6 + $0x1ac] ss:$16 sps:$4 sm:$0xff]  }
  0x73   :  { %1532 = vmatpush1.bf16.msra.mxu0 %v2757_v63  ;;  %1492 = vmatprep.subr.bf16.mxu1 %v2758_v0  ;;  %v2846_v63 = vld [vmem:[#allocation6 + $0x5a0] ss:$16 sps:$4 sm:$0xff]   ;;  %v2849_v0 = vld [vmem:[#allocation6 + $0x1a8] ss:$16 sps:$4 sm:$0xff]  }
  0x74   :  { %1533 = vmatprep.subr.bf16.mxu0 %v2760_v1  ;;  %v2854_v1 = vld [vmem:[#allocation6 + $0x5c4] ss:$16 sps:$4 sm:$0xff]  }
  0x76   :  { %1493 = vmatpush1.bf16.msra.mxu1 %v2762_v2  ;;  %v2857_v2 = vld [vmem:[#allocation6 + $0x1cc] ss:$16 sps:$4 sm:$0xff]  }
  0x77   :  { %1534 = vmatpush1.bf16.msra.mxu0 %v2763_v3  ;;  %1626 = vmatprep.subr.bf16.mxu1 %v2773_v5  ;;  %v2852_v3 = vld [vmem:[#allocation6 + $0x5c0] ss:$16 sps:$4 sm:$0xff]   ;;  %v2860_v5 = vld [vmem:[#allocation6 + $0x5e4] ss:$16 sps:$4 sm:$0xff]  }
  0x78   :  { %1544 = vmatprep.subr.bf16.mxu0 %v2770_v4  ;;  %v2855_v4 = vld [vmem:[#allocation6 + $0x1c8] ss:$16 sps:$4 sm:$0xff]  }
  0x79   :  { %1495 = vmatmul.mubr.bf16.vlgmr.msra.gmra.mrb[0].mxu1 %v3307_v6 }
  0x7a   :  { %1536 = vmatmul.mubr.bf16.vlgmr.msra.gmra.mrb[0].mxu0 %v3309_v7  ;;  %1627 = vmatpush1.bf16.msra.mxu1 %v2771_v9  ;;  %v2858_v9 = vld [vmem:[#allocation6 + $0x5e0] ss:$16 sps:$4 sm:$0xff]  }
  0x7b   :  { %1545 = vmatpush1.bf16.msra.mxu0 %v2768_v8  ;;  %1628 = vmatprep.subr.bf16.mxu1 %v2779_v11  ;;  %v2863_v8 = vld [vmem:[#allocation6 + $0x1ec] ss:$16 sps:$4 sm:$0xff]   ;;  %v2868_v11 = vld [vmem:[#allocation6 + $0x604] ss:$16 sps:$4 sm:$0xff]  }
  0x7c   :  { %1546 = vmatprep.subr.bf16.mxu0 %v2776_v10  ;;  %1658 = vmatprep.mubr.bf16.mxu1 %v3301_v47  ;;  %v2825_v47 = vld [vmem:[#allocation6 + $0x128] ss:$16 sps:$4 sm:$0xff]  }
  0x7d   :  { %1576 = vmatprep.mubr.bf16.mxu0 %v3318_v34  ;;  %v2861_v10 = vld [vmem:[#allocation6 + $0x1e8] ss:$16 sps:$4 sm:$0xff]  }
  0x7e   :  { %1629 = vmatpush1.bf16.msra.mxu1 %v2777_v13  ;;  %v3323_v13 = vcombine.low %v3314_v32, %v3314_v32  ;;  %v2901_v32 = vld [vmem:[#allocation6 + $0x2ac] ss:$16 sps:$4 sm:$0xff]  }
  0x7f   :  { %1547 = vmatpush1.bf16.msra.mxu0 %v2774_v12  ;;  %1630 = vmatprep.subr.bf16.mxu1 %v2785_v15  ;;  %v2871_v12 = vld [vmem:[#allocation6 + $0x20c] ss:$16 sps:$4 sm:$0xff]   ;;  %v2869_v15 = vld [vmem:[#allocation6 + $0x208] ss:$16 sps:$4 sm:$0xff]  }
  0x80   :  { %1548 = vmatprep.subr.bf16.mxu0 %v2782_v14  ;;  %v2866_v14 = vld [vmem:[#allocation6 + $0x600] ss:$16 sps:$4 sm:$0xff]  }
  0x82   :  { %1631 = vmatpush1.bf16.msra.mxu1 %v2783_v17  ;;  %v2877_v17 = vld [vmem:[#allocation6 + $0x22c] ss:$16 sps:$4 sm:$0xff]  }
  0x83   :  { %1549 = vmatpush1.bf16.msra.mxu0 %v2780_v16  ;;  %1632 = vmatprep.subr.bf16.mxu1 %v2791_v19  ;;  %v2874_v16 = vld [vmem:[#allocation6 + $0x624] ss:$16 sps:$4 sm:$0xff]   ;;  %v2875_v19 = vld [vmem:[#allocation6 + $0x228] ss:$16 sps:$4 sm:$0xff]  }
  0x84   :  { %1550 = vmatprep.subr.bf16.mxu0 %v2788_v18  ;;  %v2872_v18 = vld [vmem:[#allocation6 + $0x620] ss:$16 sps:$4 sm:$0xff]  }
  0x86   :  { %1633 = vmatpush1.bf16.msra.mxu1 %v2789_v21  ;;  %v2883_v21 = vld [vmem:[#allocation6 + $0x24c] ss:$16 sps:$4 sm:$0xff]  }
  0x87   :  { %1551 = vmatpush1.bf16.msra.mxu0 %v2786_v20  ;;  %1634 = vmatprep.subr.bf16.mxu1 %v2797_v23  ;;  %v2880_v20 = vld [vmem:[#allocation6 + $0x644] ss:$16 sps:$4 sm:$0xff]   ;;  %v2878_v23 = vld [vmem:[#allocation6 + $0x640] ss:$16 sps:$4 sm:$0xff]  }
  0x88   :  { %1552 = vmatprep.subr.bf16.mxu0 %v2794_v22  ;;  %v3222_v22 = vmov 0  }
  0x8a   :  { %1635 = vmatpush1.bf16.msra.mxu1 %v2795_v25  ;;  %v2889_v25 = vld [vmem:[#allocation6 + $0x26c] ss:$16 sps:$4 sm:$0xff]  }
  0x8b   :  { %1553 = vmatpush1.bf16.msra.mxu0 %v2792_v24  ;;  %1636 = vmatprep.subr.bf16.mxu1 %v2803_v27  ;;  %v2881_v24 = vld [vmem:[#allocation6 + $0x248] ss:$16 sps:$4 sm:$0xff]  }
  0x8c   :  { %1554 = vmatprep.subr.bf16.mxu0 %v2800_v26  ;;  %v2884_v26 = vld [vmem:[#allocation6 + $0x660] ss:$16 sps:$4 sm:$0xff]   ;;  %v2887_v27 = vld [vmem:[#allocation6 + $0x268] ss:$16 sps:$4 sm:$0xff]  }
  0x8e   :  { %1637 = vmatpush1.bf16.msra.mxu1 %v2801_v29  ;;  %v2895_v29 = vld [vmem:[#allocation6 + $0x28c] ss:$16 sps:$4 sm:$0xff]  }
  0x8f   :  { %1555 = vmatpush1.bf16.msra.mxu0 %v2798_v28  ;;  %1638 = vmatprep.subr.bf16.mxu1 %v2809_v31  ;;  %v2892_v28 = vld [vmem:[#allocation6 + $0x684] ss:$16 sps:$4 sm:$0xff]  }
  0x90   :  { %1556 = vmatprep.subr.bf16.mxu0 %v2806_v30  ;;  %v2890_v30 = vld [vmem:[#allocation6 + $0x680] ss:$16 sps:$4 sm:$0xff]   ;;  %v2898_v31 = vld [vmem:[#allocation6 + $0x6a4] ss:$16 sps:$4 sm:$0xff]  }
  0x92   :  { %1639 = vmatpush1.bf16.msra.mxu1 %v2807_v35  ;;  %v2899_v35 = vld [vmem:[#allocation6 + $0x2a8] ss:$16 sps:$4 sm:$0xff]  }
  0x93   :  { %1557 = vmatpush1.bf16.msra.mxu0 %v2804_v33  ;;  %1640 = vmatprep.subr.bf16.mxu1 %v2815_v37  ;;  %v2896_v33 = vld [vmem:[#allocation6 + $0x6a0] ss:$16 sps:$4 sm:$0xff]   ;;  %v2907_v37 = vld [vmem:[#allocation6 + $0x2cc] ss:$16 sps:$4 sm:$0xff]  }
  0x94   :  { %1558 = vmatprep.subr.bf16.mxu0 %v2812_v36  ;;  %v2904_v36 = vld [vmem:[#allocation6 + $0x6c4] ss:$16 sps:$4 sm:$0xff]  }
  0x96   :  { %1641 = vmatpush1.bf16.msra.mxu1 %v2813_v39  ;;  %v2905_v39 = vld [vmem:[#allocation6 + $0x2c8] ss:$16 sps:$4 sm:$0xff]  }
  0x97   :  { %1559 = vmatpush1.bf16.msra.mxu0 %v2810_v38  ;;  %1642 = vmatprep.subr.bf16.mxu1 %v2821_v41  ;;  %v2902_v38 = vld [vmem:[#allocation6 + $0x6c0] ss:$16 sps:$4 sm:$0xff]   ;;  %v2913_v41 = vld [vmem:[#allocation6 + $0x2ec] ss:$16 sps:$4 sm:$0xff]  }
  0x98   :  { %1560 = vmatprep.subr.bf16.mxu0 %v2818_v40  ;;  %v2910_v40 = vld [vmem:[#allocation6 + $0x6e4] ss:$16 sps:$4 sm:$0xff]  }
  0x9a   :  { %1643 = vmatpush1.bf16.msra.mxu1 %v2819_v43  ;;  %v2911_v43 = vld [vmem:[#allocation6 + $0x2e8] ss:$16 sps:$4 sm:$0xff]  }
  0x9b   :  { %1561 = vmatpush1.bf16.msra.mxu0 %v2816_v42  ;;  %1644 = vmatprep.subr.bf16.mxu1 %v2827_v45  ;;  %v2908_v42 = vld [vmem:[#allocation6 + $0x6e0] ss:$16 sps:$4 sm:$0xff]   ;;  %v3329_v45 = vld [vmem:[#allocation2 + $0x18] ss:$0 sps:$4 sm:$0xff]  }
  0x9c   :  { %1562 = vmatprep.subr.bf16.mxu0 %v2824_v44  ;;  %v2917_v44 = vld [vmem:[#allocation6 + $0x30c] ss:$16 sps:$4 sm:$0xff]  }
  0x9e   :  { %1645 = vmatpush1.bf16.msra.mxu1 %v2825_v47  ;;  %v2920_v47 = vld [vmem:[#allocation6 + $0x32c] ss:$16 sps:$4 sm:$0xff]  }
  0x9f   :  { %1563 = vmatpush1.bf16.msra.mxu0 %v2822_v46  ;;  %1646 = vmatprep.subr.bf16.mxu1 %v2833_v49  ;;  %v2915_v46 = vld [vmem:[#allocation6 + $0x308] ss:$16 sps:$4 sm:$0xff]   ;;  %v3013_v49 = vld [vmem:[#allocation8 + $0x4] ss:$8 sps:$4 sm:$0xff]  }
  0xa0   :  { %1564 = vmatprep.subr.bf16.mxu0 %v2830_v48  ;;  %v3011_v48 = vld [vmem:[#allocation8] ss:$8 sps:$4 sm:$0xff]  }
  0xa2   :  { %1647 = vmatpush1.bf16.msra.mxu1 %v2831_v52  ;;  %v3016_v52 = vld [vmem:[#allocation8 + $0x14] ss:$8 sps:$4 sm:$0xff]  }
  0xa3   :  { %1565 = vmatpush1.bf16.msra.mxu0 %v2828_v50  ;;  %1648 = vmatprep.subr.bf16.mxu1 %v2839_v54  ;;  %v2918_v50 = vld [vmem:[#allocation6 + $0x328] ss:$16 sps:$4 sm:$0xff]  }
  0xa4   :  { %1566 = vmatprep.subr.bf16.mxu0 %v2836_v53  ;;  %v2923_v53 = vld [vmem:[#allocation6 + $0x34c] ss:$16 sps:$4 sm:$0xff]   ;;  %v3014_v54 = vld [vmem:[#allocation8 + $0x10] ss:$8 sps:$4 sm:$0xff]  }
  0xa6   :  { %1649 = vmatpush1.bf16.msra.mxu1 %v2837_v56  ;;  %v2921_v56 = vld [vmem:[#allocation6 + $0x348] ss:$16 sps:$4 sm:$0xff]  }
  0xa7   :  { %1567 = vmatpush1.bf16.msra.mxu0 %v2834_v55  ;;  %1650 = vmatprep.subr.bf16.mxu1 %v2845_v58  ;;  %v3019_v55 = vld [vmem:[#allocation8 + $0x24] ss:$8 sps:$4 sm:$0xff]   ;;  %v3017_v58 = vld [vmem:[#allocation8 + $0x20] ss:$8 sps:$4 sm:$0xff]  }
  0xa8   :  { %1568 = vmatprep.subr.bf16.mxu0 %v2842_v57  ;;  %v2926_v57 = vld [vmem:[#allocation6 + $0x36c] ss:$16 sps:$4 sm:$0xff]  }
  0xaa   :  { %1651 = vmatpush1.bf16.msra.mxu1 %v2843_v60  ;;  %v2929_v60 = vld [vmem:[#allocation6 + $0x38c] ss:$16 sps:$4 sm:$0xff]  }
  0xab   :  { %1569 = vmatpush1.bf16.msra.mxu0 %v2840_v59  ;;  %1652 = vmatprep.subr.bf16.mxu1 %v2851_v62  ;;  %v2924_v59 = vld [vmem:[#allocation6 + $0x368] ss:$16 sps:$4 sm:$0xff]  }
  0xac   :  { %1570 = vmatprep.subr.bf16.mxu0 %v2848_v61  ;;  %v3022_v61 = vld [vmem:[#allocation8 + $0x34] ss:$8 sps:$4 sm:$0xff]   ;;  %v3020_v62 = vld [vmem:[#allocation8 + $0x30] ss:$8 sps:$4 sm:$0xff]  }
  0xae   :  { %1653 = vmatpush1.bf16.msra.mxu1 %v2849_v0  ;;  %v2927_v0 = vld [vmem:[#allocation6 + $0x388] ss:$16 sps:$4 sm:$0xff]  }
  0xaf   :  { %1571 = vmatpush1.bf16.msra.mxu0 %v2846_v63  ;;  %1654 = vmatprep.subr.bf16.mxu1 %v2857_v2  ;;  %v3025_v63 = vld [vmem:[#allocation8 + $0x44] ss:$8 sps:$4 sm:$0xff]   ;;  %v3023_v2 = vld [vmem:[#allocation8 + $0x40] ss:$8 sps:$4 sm:$0xff]  }
  0xb0   :  { %1572 = vmatprep.subr.bf16.mxu0 %v2854_v1  ;;  %v2932_v1 = vld [vmem:[#allocation6 + $0x3ac] ss:$16 sps:$4 sm:$0xff]  }
  0xb2   :  { %1655 = vmatpush1.bf16.msra.mxu1 %v2855_v4  ;;  %v2930_v4 = vld [vmem:[#allocation6 + $0x3a8] ss:$16 sps:$4 sm:$0xff]  }
  0xb3   :  { %1573 = vmatpush1.bf16.msra.mxu0 %v2852_v3  ;;  %1656 = vmatprep.subr.bf16.mxu1 %v2863_v8  ;;  %v3028_v3 = vld [vmem:[#allocation8 + $0x54] ss:$8 sps:$4 sm:$0xff]   ;;  %v3026_v8 = vld [vmem:[#allocation8 + $0x50] ss:$8 sps:$4 sm:$0xff]  }
  0xb4   :  { %1574 = vmatprep.subr.bf16.mxu0 %v2860_v5  ;;  %v2935_v5 = vld [vmem:[#allocation6 + $0x3cc] ss:$16 sps:$4 sm:$0xff]  }
  0xb6   :  { %1657 = vmatpush1.bf16.msra.mxu1 %v2861_v10  ;;  %v2933_v10 = vld [vmem:[#allocation6 + $0x3c8] ss:$16 sps:$4 sm:$0xff]  }
  0xb7   :  { %1575 = vmatpush1.bf16.msra.mxu0 %v2858_v9  ;;  %1667 = vmatprep.subr.bf16.mxu1 %v2871_v12  ;;  %v3031_v9 = vld [vmem:[#allocation8 + $0x64] ss:$8 sps:$4 sm:$0xff]   ;;  %v3029_v12 = vld [vmem:[#allocation8 + $0x60] ss:$8 sps:$4 sm:$0xff]  }
  0xb8   :  { %1585 = vmatprep.subr.bf16.mxu0 %v2868_v11  ;;  %v2938_v11 = vld [vmem:[#allocation6 + $0x3ec] ss:$16 sps:$4 sm:$0xff]  }
  0xb9   :  { %1659 = vmatmul.mubr.bf16.vlgmr.msra.gmra.mrb[4].mxu1 %v3307_v6  ;;  %v2886_v6 = vld [vmem:[#allocation6 + $0x664] ss:$16 sps:$4 sm:$0xff]  }
  0xba   :  { %1577 = vmatmul.mubr.bf16.vlgmr.msra.gmra.mrb[0].mxu0 %v3323_v13  ;;  %1668 = vmatpush1.bf16.msra.mxu1 %v2869_v15  ;;  %v2936_v15 = vld [vmem:[#allocation6 + $0x3e8] ss:$16 sps:$4 sm:$0xff]  }
  0xbb   :  { %1586 = vmatpush1.bf16.msra.mxu0 %v2866_v14  ;;  %1669 = vmatprep.subr.bf16.mxu1 %v2877_v17  ;;  %v3034_v14 = vld [vmem:[#allocation8 + $0x74] ss:$8 sps:$4 sm:$0xff]   ;;  %v3032_v17 = vld [vmem:[#allocation8 + $0x70] ss:$8 sps:$4 sm:$0xff]  }
  0xbc   :  { %1587 = vmatprep.subr.bf16.mxu0 %v2874_v16  ;;  %1617 = vmatprep.mubr.bf16.mxu0 %v3222_v22  ;;  %v2941_v16 = vld [vmem:[#allocation6 + $0x40c] ss:$16 sps:$4 sm:$0xff]  }
  0xbd   :  { %1699 = vmatprep.mubr.bf16.mxu1 %v3303_v51  ;;  %v2893_v51 = vld [vmem:[#allocation6 + $0x288] ss:$16 sps:$4 sm:$0xff]  }
  0xbe   :  { %1670 = vmatpush1.bf16.msra.mxu1 %v2875_v19  ;;  %v2939_v19 = vld [vmem:[#allocation6 + $0x408] ss:$16 sps:$4 sm:$0xff]  }
  0xbf   :  { %1588 = vmatpush1.bf16.msra.mxu0 %v2872_v18  ;;  %1671 = vmatprep.subr.bf16.mxu1 %v2883_v21  ;;  %v3037_v18 = vld [vmem:[#allocation8 + $0x84] ss:$8 sps:$4 sm:$0xff]   ;;  %v3035_v21 = vld [vmem:[#allocation8 + $0x80] ss:$8 sps:$4 sm:$0xff]  }
  0xc0   :  { %1589 = vmatprep.subr.bf16.mxu0 %v2880_v20  ;;  %v2944_v20 = vld [vmem:[#allocation6 + $0x42c] ss:$16 sps:$4 sm:$0xff]  }
  0xc2   :  { %1672 = vmatpush1.bf16.msra.mxu1 %v2881_v24  ;;  %v2942_v24 = vld [vmem:[#allocation6 + $0x428] ss:$16 sps:$4 sm:$0xff]  }
  0xc3   :  { %1590 = vmatpush1.bf16.msra.mxu0 %v2878_v23  ;;  %1673 = vmatprep.subr.bf16.mxu1 %v2889_v25  ;;  %v3040_v23 = vld [vmem:[#allocation8 + $0x94] ss:$8 sps:$4 sm:$0xff]   ;;  %v3038_v25 = vld [vmem:[#allocation8 + $0x90] ss:$8 sps:$4 sm:$0xff]  }
  0xc4   :  { %1591 = vmatprep.subr.bf16.mxu0 %v2886_v6  ;;  %v2947_v6 = vld [vmem:[#allocation6 + $0x44c] ss:$16 sps:$4 sm:$0xff]  }
  0xc6   :  { %1674 = vmatpush1.bf16.msra.mxu1 %v2887_v27  ;;  %v2945_v27 = vld [vmem:[#allocation6 + $0x448] ss:$16 sps:$4 sm:$0xff]  }
  0xc7   :  { %1592 = vmatpush1.bf16.msra.mxu0 %v2884_v26  ;;  %1675 = vmatprep.subr.bf16.mxu1 %v2895_v29  ;;  %v3043_v26 = vld [vmem:[#allocation8 + $0xa4] ss:$8 sps:$4 sm:$0xff]   ;;  %v3041_v29 = vld [vmem:[#allocation8 + $0xa0] ss:$8 sps:$4 sm:$0xff]  }
  0xc8   :  { %1593 = vmatprep.subr.bf16.mxu0 %v2892_v28  ;;  %v2950_v28 = vld [vmem:[#allocation6 + $0x46c] ss:$16 sps:$4 sm:$0xff]  }
  0xca   :  { %1676 = vmatpush1.bf16.msra.mxu1 %v2893_v51  ;;  %v2953_v51 = vld [vmem:[#allocation6 + $0x48c] ss:$16 sps:$4 sm:$0xff]  }
  0xcb   :  { %1594 = vmatpush1.bf16.msra.mxu0 %v2890_v30  ;;  %1677 = vmatprep.subr.bf16.mxu1 %v2901_v32  ;;  %v2948_v30 = vld [vmem:[#allocation6 + $0x468] ss:$16 sps:$4 sm:$0xff]  }
  0xcc   :  { %1595 = vmatprep.subr.bf16.mxu0 %v2898_v31  ;;  %v3049_v31 = vld [vmem:[#allocation8 + $0xc4] ss:$8 sps:$4 sm:$0xff]   ;;  %v2951_v32 = vld [vmem:[#allocation6 + $0x488] ss:$16 sps:$4 sm:$0xff]  }
  0xce   :  { %1678 = vmatpush1.bf16.msra.mxu1 %v2899_v35  ;;  %v3047_v35 = vld [vmem:[#allocation8 + $0xc0] ss:$8 sps:$4 sm:$0xff]  }
  0xcf   :  { %1596 = vmatpush1.bf16.msra.mxu0 %v2896_v33  ;;  %1679 = vmatprep.subr.bf16.mxu1 %v2907_v37  ;;  %v2956_v33 = vld [vmem:[#allocation6 + $0x4ac] ss:$16 sps:$4 sm:$0xff]   ;;  %v2954_v37 = vld [vmem:[#allocation6 + $0x4a8] ss:$16 sps:$4 sm:$0xff]  }
  0xd0   :  { %1597 = vmatprep.subr.bf16.mxu0 %v2904_v36  ;;  %v3052_v36 = vld [vmem:[#allocation8 + $0xd4] ss:$8 sps:$4 sm:$0xff]  }
  0xd2   :  { %1680 = vmatpush1.bf16.msra.mxu1 %v2905_v39  ;;  %v3050_v39 = vld [vmem:[#allocation8 + $0xd0] ss:$8 sps:$4 sm:$0xff]  }
  0xd3   :  { %1598 = vmatpush1.bf16.msra.mxu0 %v2902_v38  ;;  %1681 = vmatprep.subr.bf16.mxu1 %v2913_v41  ;;  %v2959_v38 = vld [vmem:[#allocation6 + $0x4cc] ss:$16 sps:$4 sm:$0xff]  }
  0xd4   :  { %1599 = vmatprep.subr.bf16.mxu0 %v2910_v40  ;;  %v2957_v40 = vld [vmem:[#allocation6 + $0x4c8] ss:$16 sps:$4 sm:$0xff]   ;;  %v2962_v41 = vld [vmem:[#allocation6 + $0x4ec] ss:$16 sps:$4 sm:$0xff]  }
  0xd6   :  { %1682 = vmatpush1.bf16.msra.mxu1 %v2911_v43  ;;  %v2965_v43 = vld [vmem:[#allocation6 + $0x50c] ss:$16 sps:$4 sm:$0xff]  }
  0xd7   :  { %1600 = vmatpush1.bf16.msra.mxu0 %v2908_v42  ;;  %1683 = vmatprep.subr.bf16.mxu1 %v2917_v44  ;;  %v2960_v42 = vld [vmem:[#allocation6 + $0x4e8] ss:$16 sps:$4 sm:$0xff]  }
  0xd8   :  { %2194 = vmatprep.subr.bf16.mxu0 %v3013_v49  ;;  %v2963_v44 = vld [vmem:[#allocation6 + $0x508] ss:$16 sps:$4 sm:$0xff]  }
  0xd9   :  { %v2969_v49 = vld [vmem:[#allocation6 + $0x548] ss:$16 sps:$4 sm:$0xff]  }
  0xda   :  { %1618 = vmatmul.mubr.bf16.vlgmr.msra.gmra.mrb[0].mxu0 %v3329_v45  ;;  %1684 = vmatpush1.bf16.msra.mxu1 %v2915_v46  ;;  %v2968_v46 = vld [vmem:[#allocation6 + $0x52c] ss:$16 sps:$4 sm:$0xff]  }
  0xdb   :  { %1685 = vmatprep.subr.bf16.mxu1 %v2920_v47  ;;  %2195 = vmatpush1.bf16.msra.mxu0 %v3011_v48  ;;  %v2966_v47 = vld [vmem:[#allocation6 + $0x528] ss:$16 sps:$4 sm:$0xff]   ;;  %v2971_v48 = vld [vmem:[#allocation6 + $0x54c] ss:$16 sps:$4 sm:$0xff]  }
  0xdc   :  { %2196 = vmatprep.subr.bf16.mxu0 %v3016_v52  ;;  %v2972_v52 = vld [vmem:[#allocation6 + $0x568] ss:$16 sps:$4 sm:$0xff]  }
  0xde   :  { %1686 = vmatpush1.bf16.msra.mxu1 %v2918_v50  ;;  %v2974_v50 = vld [vmem:[#allocation6 + $0x56c] ss:$16 sps:$4 sm:$0xff]  }
  0xdf   :  { %1687 = vmatprep.subr.bf16.mxu1 %v2923_v53  ;;  %2197 = vmatpush1.bf16.msra.mxu0 %v3014_v54  ;;  %v2977_v53 = vld [vmem:[#allocation6 + $0x58c] ss:$16 sps:$4 sm:$0xff]   ;;  %v2975_v54 = vld [vmem:[#allocation6 + $0x588] ss:$16 sps:$4 sm:$0xff]  }
  0xe0   :  { %2198 = vmatprep.subr.bf16.mxu0 %v3019_v55  ;;  %v2980_v55 = vld [vmem:[#allocation6 + $0x5ac] ss:$16 sps:$4 sm:$0xff]  }
  0xe2   :  { %1688 = vmatpush1.bf16.msra.mxu1 %v2921_v56  ;;  %v2978_v56 = vld [vmem:[#allocation6 + $0x5a8] ss:$16 sps:$4 sm:$0xff]  }
  0xe3   :  { %1689 = vmatprep.subr.bf16.mxu1 %v2926_v57  ;;  %2199 = vmatpush1.bf16.msra.mxu0 %v3017_v58  ;;  %v2983_v57 = vld [vmem:[#allocation6 + $0x5cc] ss:$16 sps:$4 sm:$0xff]  }
  0xe4   :  { %2200 = vmatprep.subr.bf16.mxu0 %v3022_v61  ;;  %v3055_v58 = vld [vmem:[#allocation8 + $0xe4] ss:$8 sps:$4 sm:$0xff]  }
  0xe5   :  { %v2986_v61 = vld [vmem:[#allocation6 + $0x5ec] ss:$16 sps:$4 sm:$0xff]  }
  0xe6   :  { %1690 = vmatpush1.bf16.msra.mxu1 %v2924_v59  ;;  %v3053_v59 = vld [vmem:[#allocation8 + $0xe0] ss:$8 sps:$4 sm:$0xff]  }
  0xe7   :  { %1691 = vmatprep.subr.bf16.mxu1 %v2929_v60  ;;  %2201 = vmatpush1.bf16.msra.mxu0 %v3020_v62  ;;  %v2981_v60 = vld [vmem:[#allocation6 + $0x5c8] ss:$16 sps:$4 sm:$0xff]   ;;  %v3058_v62 = vld [vmem:[#allocation8 + $0xf4] ss:$8 sps:$4 sm:$0xff]  }
  0xe8   :  { %2202 = vmatprep.subr.bf16.mxu0 %v3025_v63  ;;  %v3056_v63 = vld [vmem:[#allocation8 + $0xf0] ss:$8 sps:$4 sm:$0xff]  }
  0xea   :  { %1692 = vmatpush1.bf16.msra.mxu1 %v2927_v0  ;;  %v2984_v0 = vld [vmem:[#allocation6 + $0x5e8] ss:$16 sps:$4 sm:$0xff]  }
  0xeb   :  { %1693 = vmatprep.subr.bf16.mxu1 %v2932_v1  ;;  %2203 = vmatpush1.bf16.msra.mxu0 %v3023_v2  ;;  %v2989_v1 = vld [vmem:[#allocation6 + $0x60c] ss:$16 sps:$4 sm:$0xff]  }
  0xec   :  { %2204 = vmatprep.subr.bf16.mxu0 %v3028_v3  ;;  %v3061_v2 = vld [vmem:[#allocation8 + $0x104] ss:$8 sps:$4 sm:$0xff]   ;;  %v2987_v3 = vld [vmem:[#allocation6 + $0x608] ss:$16 sps:$4 sm:$0xff]  }
  0xee   :  { %1694 = vmatpush1.bf16.msra.mxu1 %v2930_v4  ;;  %v2992_v4 = vld [vmem:[#allocation6 + $0x62c] ss:$16 sps:$4 sm:$0xff]  }
  0xef   :  { %1695 = vmatprep.subr.bf16.mxu1 %v2935_v5  ;;  %2205 = vmatpush1.bf16.msra.mxu0 %v3026_v8  ;;  %v2990_v5 = vld [vmem:[#allocation6 + $0x628] ss:$16 sps:$4 sm:$0xff]   ;;  %v2995_v8 = vld [vmem:[#allocation6 + $0x64c] ss:$16 sps:$4 sm:$0xff]  }
  0xf0   :  { %2206 = vmatprep.subr.bf16.mxu0 %v3031_v9  ;;  %v2993_v9 = vld [vmem:[#allocation6 + $0x648] ss:$16 sps:$4 sm:$0xff]  }
  0xf2   :  { %1696 = vmatpush1.bf16.msra.mxu1 %v2933_v10  ;;  %v2998_v10 = vld [vmem:[#allocation6 + $0x66c] ss:$16 sps:$4 sm:$0xff]  }
  0xf3   :  { %1697 = vmatprep.subr.bf16.mxu1 %v2938_v11  ;;  %2207 = vmatpush1.bf16.msra.mxu0 %v3029_v12  ;;  %v2996_v11 = vld [vmem:[#allocation6 + $0x668] ss:$16 sps:$4 sm:$0xff]   ;;  %v3001_v12 = vld [vmem:[#allocation6 + $0x68c] ss:$16 sps:$4 sm:$0xff]  }
  0xf4   :  { %2208 = vmatprep.subr.bf16.mxu0 %v3034_v14  ;;  %v2999_v14 = vld [vmem:[#allocation6 + $0x688] ss:$16 sps:$4 sm:$0xff]  }
  0xf6   :  { %1698 = vmatpush1.bf16.msra.mxu1 %v2936_v15  ;;  %v3004_v15 = vld [vmem:[#allocation6 + $0x6ac] ss:$16 sps:$4 sm:$0xff]  }
  0xf7   :  { %1708 = vmatprep.subr.bf16.mxu1 %v2941_v16  ;;  %2209 = vmatpush1.bf16.msra.mxu0 %v3032_v17  ;;  %v3007_v16 = vld [vmem:[#allocation6 + $0x6cc] ss:$16 sps:$4 sm:$0xff]  }
  0xf8   :  { %2210 = vmatprep.subr.bf16.mxu0 %v3037_v18 }
  0xf9   :  { %1700 = vmatmul.mubr.bf16.vlgmr.msra.gmra.mrb[4].mxu1 %v3309_v7  ;;  %v3046_v7 = vld [vmem:[#allocation8 + $0xb4] ss:$8 sps:$4 sm:$0xff]  }
  0xfa   :  { %1709 = vmatpush1.bf16.msra.mxu1 %v2939_v19  ;;  %1740 = vmatprep.mubr.bf16.mxu1 %v3318_v34  ;;  %v3044_v34 = vld [vmem:[#allocation8 + $0xb0] ss:$8 sps:$4 sm:$0xff]  }
  0xfb   :  { %1710 = vmatprep.subr.bf16.mxu1 %v2944_v20  ;;  %2211 = vmatpush1.bf16.msra.mxu0 %v3035_v21  ;;  %v3005_v19 = vld [vmem:[#allocation6 + $0x6c8] ss:$16 sps:$4 sm:$0xff]   ;;  %v3010_v21 = vld [vmem:[#allocation6 + $0x6ec] ss:$16 sps:$4 sm:$0xff]  }
  0xfc   :  { %2212 = vmatprep.subr.bf16.mxu0 %v3040_v23  ;;  %v3008_v23 = vld [vmem:[#allocation6 + $0x6e8] ss:$16 sps:$4 sm:$0xff]  }
  0xfe   :  { %1711 = vmatpush1.bf16.msra.mxu1 %v2942_v24  ;;  %v297_v24 = vlaneseq }
  0xff   :  { %1712 = vmatprep.subr.bf16.mxu1 %v2947_v6  ;;  %2213 = vmatpush1.bf16.msra.mxu0 %v3038_v25 }
 0x100   :  { %2214 = vmatprep.subr.bf16.mxu0 %v3043_v26  ;;  %v3337_v6 = vshrl.u32 %v297_v24, 7  ;;  %v3343_v26 = vld [vmem:[%s3392_s2] sm:$0xf] }
 0x101   :  { %v1862_v24 = vld [vmem:[%s3394_s4] sm:$0x3]  ;;  %s3223_s4 = smov [#allocation9]  }
 0x102   :  { %1713 = vmatpush1.bf16.msra.mxu1 %v2945_v27  ;;  %v299_v25 = vsub.s32 0, %v3337_v6  ;;  %v303_v27 = vsub.s32 1, %v3337_v6  ;;  %s2305_s20 = sshll.u32 %s3223_s4, 4  ;;  %s2306_s20 = int_to_ptr.vmem [resolvable:$true] %s2305_s20 }
 0x103   :  { %1714 = vmatprep.subr.bf16.mxu1 %v2950_v28  ;;  %2215 = vmatpush1.bf16.msra.mxu0 %v3041_v29  ;;  %s3175_s21 = scalar_lea.vmem %s2306_s20, 128  ;;  %p3180_p11 = scmp.lt.s32.totalorder %s2306_s20, %s2306_s20 }
 0x104   :  { %2216 = vmatprep.subr.bf16.mxu0 %v3046_v7  ;;  %v300_v28 = vrot.slane %v3343_v26, %v299_v25  ;;  %p3176_p10 = scmp.ne.s32.totalorder %s2306_s20, %s3175_s21  ;;  %p3181_p12 = scmp.lt.s32.totalorder %s3175_s21, %s3175_s21 }
 0x106   :  { %1715 = vmatpush1.bf16.msra.mxu1 %v2948_v30  ;;  %p3182_p13 = por %p3181_p12, %p3180_p11 }
 0x107   :  { %1716 = vmatprep.subr.bf16.mxu1 %v2953_v51  ;;  %2217 = vmatpush1.bf16.msra.mxu0 %v3044_v34 }
 0x108   :  { %2218 = vmatprep.subr.bf16.mxu0 %v3049_v31  ;;  %p3183_p0 = pnand %p3182_p13, %p3176_p10 }
 0x10a   :  { %1717 = vmatpush1.bf16.msra.mxu1 %v2951_v32 }
 0x10b   :  { %1718 = vmatprep.subr.bf16.mxu1 %v2956_v33  ;;  %2219 = vmatpush1.bf16.msra.mxu0 %v3047_v35 }
 0x10c   :  { %2220 = vmatprep.subr.bf16.mxu0 %v3052_v36 }
 0x10e   :  { %1719 = vmatpush1.bf16.msra.mxu1 %v2954_v37 }
 0x10f   :  { %1720 = vmatprep.subr.bf16.mxu1 %v2959_v38  ;;  %2221 = vmatpush1.bf16.msra.mxu0 %v3050_v39  ;;  %v3059_v38 = vld [vmem:[#allocation8 + $0x100] ss:$8 sps:$4 sm:$0xff]  }
 0x110   :  { %2222 = vmatprep.subr.bf16.mxu0 %v3055_v58  ;;  %v3088_v58 = vld [vmem:[#allocation8 + $0x194] ss:$8 sps:$4 sm:$0xff]  }
 0x112   :  { %1721 = vmatpush1.bf16.msra.mxu1 %v2957_v40  ;;  %v3064_v40 = vld [vmem:[#allocation8 + $0x114] ss:$8 sps:$4 sm:$0xff]  }
 0x113   :  { %1722 = vmatprep.subr.bf16.mxu1 %v2962_v41  ;;  %2223 = vmatpush1.bf16.msra.mxu0 %v3053_v59  ;;  %v3062_v41 = vld [vmem:[#allocation8 + $0x110] ss:$8 sps:$4 sm:$0xff]  }
 0x114   :  { %2224 = vmatprep.subr.bf16.mxu0 %v3058_v62  ;;  %v3086_v59 = vld [vmem:[#allocation8 + $0x190] ss:$8 sps:$4 sm:$0xff]   ;;  %v3094_v62 = vld [vmem:[#allocation8 + $0x1b4] ss:$8 sps:$4 sm:$0xff]  }
 0x116   :  { %1723 = vmatpush1.bf16.msra.mxu1 %v2960_v42  ;;  %v3067_v42 = vld [vmem:[#allocation8 + $0x124] ss:$8 sps:$4 sm:$0xff]  }
 0x117   :  { %1724 = vmatprep.subr.bf16.mxu1 %v2965_v43  ;;  %2225 = vmatpush1.bf16.msra.mxu0 %v3056_v63  ;;  %v3065_v43 = vld [vmem:[#allocation8 + $0x120] ss:$8 sps:$4 sm:$0xff]   ;;  %v3092_v63 = vld [vmem:[#allocation8 + $0x1b0] ss:$8 sps:$4 sm:$0xff]  }
 0x118   :  { %2235 = vmatprep.subr.bf16.mxu0 %v3061_v2  ;;  %v3100_v2 = vld [vmem:[#allocation8 + $0x1d4] ss:$8 sps:$4 sm:$0xff]  }
 0x11a   :  { %1725 = vmatpush1.bf16.msra.mxu1 %v2963_v44  ;;  %v3070_v44 = vld [vmem:[#allocation8 + $0x134] ss:$8 sps:$4 sm:$0xff]  }
 0x11b   :  { %1726 = vmatprep.subr.bf16.mxu1 %v2968_v46  ;;  %v3068_v46 = vld [vmem:[#allocation8 + $0x130] ss:$8 sps:$4 sm:$0xff]  }
 0x11e   :  { %1727 = vmatpush1.bf16.msra.mxu1 %v2966_v47  ;;  %v3073_v47 = vld [vmem:[#allocation8 + $0x144] ss:$8 sps:$4 sm:$0xff]  }
 0x11f   :  { %1728 = vmatprep.subr.bf16.mxu1 %v2971_v48  ;;  %v3071_v48 = vld [vmem:[#allocation8 + $0x140] ss:$8 sps:$4 sm:$0xff]  }
 0x122   :  { %1729 = vmatpush1.bf16.msra.mxu1 %v2969_v49  ;;  %v3076_v49 = vld [vmem:[#allocation8 + $0x154] ss:$8 sps:$4 sm:$0xff]  }
 0x123   :  { %1730 = vmatprep.subr.bf16.mxu1 %v2974_v50  ;;  %v3074_v50 = vld [vmem:[#allocation8 + $0x150] ss:$8 sps:$4 sm:$0xff]  }
 0x126   :  { %1731 = vmatpush1.bf16.msra.mxu1 %v2972_v52  ;;  %v3079_v52 = vld [vmem:[#allocation8 + $0x164] ss:$8 sps:$4 sm:$0xff]  }
 0x127   :  { %1732 = vmatprep.subr.bf16.mxu1 %v2977_v53  ;;  %v3077_v53 = vld [vmem:[#allocation8 + $0x160] ss:$8 sps:$4 sm:$0xff]  }
 0x12a   :  { %1733 = vmatpush1.bf16.msra.mxu1 %v2975_v54  ;;  %v3082_v54 = vld [vmem:[#allocation8 + $0x174] ss:$8 sps:$4 sm:$0xff]  }
 0x12b   :  { %1734 = vmatprep.subr.bf16.mxu1 %v2980_v55  ;;  %v3080_v55 = vld [vmem:[#allocation8 + $0x170] ss:$8 sps:$4 sm:$0xff]  }
 0x12e   :  { %1735 = vmatpush1.bf16.msra.mxu1 %v2978_v56  ;;  %v3085_v56 = vld [vmem:[#allocation8 + $0x184] ss:$8 sps:$4 sm:$0xff]  }
 0x12f   :  { %1736 = vmatprep.subr.bf16.mxu1 %v2983_v57  ;;  %v3083_v57 = vld [vmem:[#allocation8 + $0x180] ss:$8 sps:$4 sm:$0xff]  }
 0x132   :  { %1737 = vmatpush1.bf16.msra.mxu1 %v2981_v60  ;;  %v3091_v60 = vld [vmem:[#allocation8 + $0x1a4] ss:$8 sps:$4 sm:$0xff]  }
 0x133   :  { %1738 = vmatprep.subr.bf16.mxu1 %v2986_v61  ;;  %v3089_v61 = vld [vmem:[#allocation8 + $0x1a0] ss:$8 sps:$4 sm:$0xff]  }
 0x136   :  { %1739 = vmatpush1.bf16.msra.mxu1 %v2984_v0  ;;  %v3097_v0 = vld [vmem:[#allocation8 + $0x1c4] ss:$8 sps:$4 sm:$0xff]  }
 0x137   :  { %1749 = vmatprep.subr.bf16.mxu1 %v2989_v1  ;;  %v3095_v1 = vld [vmem:[#allocation8 + $0x1c0] ss:$8 sps:$4 sm:$0xff]  }
 0x139   :  { %1741 = vmatmul.mubr.bf16.vlgmr.msra.gmra.mrb[4].mxu1 %v3323_v13  ;;  %v3002_v13 = vld [vmem:[#allocation6 + $0x6a8] ss:$16 sps:$4 sm:$0xff]  }
 0x13a   :  { %1750 = vmatpush1.bf16.msra.mxu1 %v2987_v3  ;;  %1781 = vmatprep.mubr.bf16.mxu1 %v3222_v22  ;;  %v3098_v3 = vld [vmem:[#allocation8 + $0x1d0] ss:$8 sps:$4 sm:$0xff]  }
 0x13b   :  { %1751 = vmatprep.subr.bf16.mxu1 %v2992_v4  ;;  %v3103_v4 = vld [vmem:[#allocation8 + $0x1e4] ss:$8 sps:$4 sm:$0xff]  }
 0x13e   :  { %1752 = vmatpush1.bf16.msra.mxu1 %v2990_v5  ;;  %v3101_v5 = vld [vmem:[#allocation8 + $0x1e0] ss:$8 sps:$4 sm:$0xff]  }
 0x13f   :  { %1753 = vmatprep.subr.bf16.mxu1 %v2995_v8  ;;  %v3106_v8 = vld [vmem:[#allocation8 + $0x1f4] ss:$8 sps:$4 sm:$0xff]  }
 0x142   :  { %1754 = vmatpush1.bf16.msra.mxu1 %v2993_v9  ;;  %v3104_v9 = vld [vmem:[#allocation8 + $0x1f0] ss:$8 sps:$4 sm:$0xff]  }
 0x143   :  { %1755 = vmatprep.subr.bf16.mxu1 %v2998_v10  ;;  %v307_v10 = vsub.s32 2, %v3337_v6 }
 0x146   :  { %1756 = vmatpush1.bf16.msra.mxu1 %v2996_v11  ;;  %v311_v11 = vsub.s32 3, %v3337_v6 }
 0x147   :  { %1757 = vmatprep.subr.bf16.mxu1 %v3001_v12  ;;  %v308_v12 = vrot.slane %v3343_v26, %v307_v10 }
 0x14a   :  { %1758 = vmatpush1.bf16.msra.mxu1 %v2999_v14  ;;  %v312_v14 = vrot.slane %v3343_v26, %v311_v11 }
 0x14b   :  { %1759 = vmatprep.subr.bf16.mxu1 %v3004_v15 }
 0x14c   :  { %v1496_v17 = vpop.f32.mrb[0].mxu1 }
 0x14d   :  { %v1498_v22 = vpop.f32.mrb[1].mxu1  ;;  %v1497_v29 = vadd.f32 %v1496_v17, %v300_v28  ;;  %v1871_v28 = vrot.slane %v1862_v24, %v303_v27 }
 0x14e   :  { %v1500_v18 = vpop.f32.mrb[2].mxu1  ;;  %1760 = vmatpush1.bf16.msra.mxu1 %v3002_v13 }
 0x14f   :  { %v1501_v20 = vpop.f32.mrb[3].mxu1  ;;  %1761 = vmatprep.subr.bf16.mxu1 %v3007_v16 }
 0x152   :  { %1762 = vmatpush1.bf16.msra.mxu1 %v3005_v19 }
 0x153   :  { %1763 = vmatprep.subr.bf16.mxu1 %v3010_v21 }
 0x156   :  { %1764 = vmatpush1.bf16.msra.mxu1 %v3008_v23 }
 0x159   :  { %1782 = vmatmul.mubr.bf16.vlgmr.msra.gmra.mrb[4].mxu1 %v3329_v45  ;;  %v304_v45 = vrot.slane %v3343_v26, %v303_v27 }
 0x15b   :  { %v1499_v7 = vadd.f32 %v1498_v22, %v304_v45 }
 0x1ad   :  { %v1619_v30 = vpop.f32.mrb[0].mxu0 }
 0x1ae   :  { %v2625_v51 = vadd.f32 %v1619_v30, %v1497_v29  ;;  %v1621_v34 = vpop.f32.mrb[1].mxu0 }
 0x1af   :  { %v2627_v31 = vadd.f32 %v1621_v34, %v1499_v7  ;;  %v1623_v32 = vpop.f32.mrb[2].mxu0  ;;  %v1867_v34 = vrot.slane %v1862_v24, %v299_v25 }
 0x1b0   :  { %v1790_v33 = vmax.f32 %v2625_v51, 0.0  ;;  %v1624_v35 = vpop.f32.mrb[3].mxu0  ;;  %v2278_v32 = vld [vmem:[%s3395_s5] sm:$0xff] }
 0x1b1   :  { %v1791_v36 = vmax.f32 %v2627_v31, 0.0 }
 0x1b2   :  { %v1794_v39 = vpack.c.bf16 %v1790_v33, %v1790_v33 }
 0x1b3   :  { %v1795_v37 = vpack.c.bf16 %v1791_v36, %v1791_v36 }
 0x1b5   :  { %2226 = vmatprep.mubr.bf16.mxu0 %v1795_v37 }
 0x1b6   :  { %2227 = vmatmul.mubr.bf16.vlgmr.msra.gmra.mrb[4].mxu0 %v1794_v39 }
 0x1b7   :  { %2236 = vmatpush1.bf16.msra.mxu0 %v3059_v38 }
 0x1b8   :  { %2237 = vmatprep.subr.bf16.mxu0 %v3064_v40 }
 0x1bb   :  { %2238 = vmatpush1.bf16.msra.mxu0 %v3062_v41 }
 0x1bc   :  { %2239 = vmatprep.subr.bf16.mxu0 %v3067_v42 }
 0x1bf   :  { %2240 = vmatpush1.bf16.msra.mxu0 %v3065_v43 }
 0x1c0   :  { %2241 = vmatprep.subr.bf16.mxu0 %v3070_v44 }
 0x1c3   :  { %2242 = vmatpush1.bf16.msra.mxu0 %v3068_v46 }
 0x1c4   :  { %2243 = vmatprep.subr.bf16.mxu0 %v3073_v47 }
 0x1c7   :  { %2244 = vmatpush1.bf16.msra.mxu0 %v3071_v48 }
 0x1c8   :  { %2245 = vmatprep.subr.bf16.mxu0 %v3076_v49 }
 0x1cb   :  { %2246 = vmatpush1.bf16.msra.mxu0 %v3074_v50 }
 0x1cc   :  { %2247 = vmatprep.subr.bf16.mxu0 %v3079_v52 }
 0x1cf   :  { %2248 = vmatpush1.bf16.msra.mxu0 %v3077_v53 }
 0x1d0   :  { %2249 = vmatprep.subr.bf16.mxu0 %v3082_v54 }
 0x1d3   :  { %2250 = vmatpush1.bf16.msra.mxu0 %v3080_v55 }
 0x1d4   :  { %2251 = vmatprep.subr.bf16.mxu0 %v3085_v56 }
 0x1d7   :  { %2252 = vmatpush1.bf16.msra.mxu0 %v3083_v57 }
 0x1d8   :  { %2253 = vmatprep.subr.bf16.mxu0 %v3088_v58 }
 0x1db   :  { %2254 = vmatpush1.bf16.msra.mxu0 %v3086_v59 }
 0x1dc   :  { %2255 = vmatprep.subr.bf16.mxu0 %v3091_v60 }
 0x1df   :  { %2256 = vmatpush1.bf16.msra.mxu0 %v3089_v61 }
 0x1e0   :  { %2257 = vmatprep.subr.bf16.mxu0 %v3094_v62 }
 0x1e3   :  { %2258 = vmatpush1.bf16.msra.mxu0 %v3092_v63 }
 0x1e4   :  { %2259 = vmatprep.subr.bf16.mxu0 %v3097_v0 }
 0x1e7   :  { %2260 = vmatpush1.bf16.msra.mxu0 %v3095_v1 }
 0x1e8   :  { %2261 = vmatprep.subr.bf16.mxu0 %v3100_v2 }
 0x1eb   :  { %2262 = vmatpush1.bf16.msra.mxu0 %v3098_v3 }
 0x1ec   :  { %2263 = vmatprep.subr.bf16.mxu0 %v3103_v4 }
 0x1ef   :  { %2264 = vmatpush1.bf16.msra.mxu0 %v3101_v5 }
 0x1f0   :  { %2265 = vmatprep.subr.bf16.mxu0 %v3106_v8 }
 0x1f3   :  { %2266 = vmatpush1.bf16.msra.mxu0 %v3104_v9 }
 0x22c   :  { %v1783_v15 = vpop.f32.mrb[4].mxu1 }
 0x22d   :  { %v2628_v13 = vadd.f32 %v1783_v15, %v308_v12  ;;  %v1785_v16 = vpop.f32.mrb[5].mxu1 }
 0x22e   :  { %v2629_v17 = vadd.f32 %v1785_v16, %v312_v14  ;;  %v1787_v22 = vpop.f32.mrb[6].mxu1 }
 0x22f   :  { %v1792_v18 = vmax.f32 %v2628_v13, 0.0  ;;  %v1788_v19 = vpop.f32.mrb[7].mxu1 }
 0x230   :  { %v1793_v20 = vmax.f32 %v2629_v17, 0.0 }
 0x231   :  { %v1796_v23 = vpack.c.bf16 %v1792_v18, %v1792_v18 }
 0x232   :  { %v1797_v21 = vpack.c.bf16 %v1793_v20, %v1793_v20 }
 0x234   :  { %2267 = vmatprep.mubr.bf16.mxu0 %v1797_v21 }
 0x235   :  { %2268 = vmatmul.mubr.bf16.vlgmr.msra.gmra.mrb[4].mxu0 %v1796_v23 }
 0x308   :  { %v2269_v26 = vpop.f32.mrb[4].mxu0 }
 0x309   :  { %v2271_v45 = vpop.f32.mrb[5].mxu0  ;;  %v2630_v31 = vadd.f32 %v2269_v26, %v1867_v34 }
 0x30a   :  { %v2631_v29 = vadd.f32 %v2271_v45, %v1871_v28  ;;  %v2273_v7 = vpop.f32.mrb[6].mxu0 }
 0x30b   :  { %v2274_v30 = vpop.f32.mrb[7].mxu0  ;;  %v2283_v35 = vmul.f32 %v2630_v31, %v2630_v31 }
 0x30c   :  { %v2276_v51 = vmul.f32 1.442695, %v2631_v29 }
 0x30e   :  { %3107 = vpow2.f32 %v2276_v51 }
 0x318   :  { %v3108_v33 = vpop.eup %3107 }
 0x319   :  { %v2282_v36 = vmul.f32 %v3108_v33, %v3108_v33  ;;  %v2279_v37 = vmul.f32 %v3108_v33, %v2278_v32 }
 0x31b   :  { %v2284_v27 = vadd.f32 %v2283_v35, %v2282_v36  ;;  %v2280_v38 = vadd.f32 %v2630_v31, %v2279_v37 }
 0x31d   :  { %v2285_v39 = vmul.f32 0.5, %v2284_v27  ;;  %2281 = vst [vmem:[#allocation9] sm:$0xff] %v2280_v38 }
 0x31f   :  { %v2286_v40 = vsub.f32 %v2285_v39, %v2631_v29 }
 0x321   :  { %v2623_v41 = vadd.f32 -0.5, %v2286_v40 }
 0x323   :  { %2288 = vadd.xlane.f32.xlu0 %v2623_v41 }
 0x324   :  { %3186 = shalt.err (!%p3183_p0)
}
 0x325   :  { %s3187_s23 = scalar_lea.hbm %s3396_s6, 128 }
 0x326   :  { %p3188_p1 = scmp.ne.s32.totalorder %s3396_s6, %s3187_s23  ;;  %p3191_p2 = scmp.lt.u32.totalorder %s3187_s23, %s3396_s6 }
 0x328   :  { %p3193_p3 = pnand %p3191_p2, %p3188_p1 }
 0x32a   :  { %3196 = shalt.err (!%p3193_p3)
}
 0x32b   :  { %2308 = dma.vmem_to_hbm [thread:$0]  %s2306_s20, 128, %s3396_s6, [#allocation4]  }
 0x32c   :  { %s3197_s9 = scalar_lea.hbm %s3397_s7, 16 }
 0x32d   :  { %p3198_p4 = scmp.ne.s32.totalorder %s3397_s7, %s3197_s9  ;;  %p3201_p5 = scmp.lt.u32.totalorder %s3197_s9, %s3397_s7 }
 0x32f   :  { %p3203_p6 = pnand %p3201_p5, %p3198_p4 }
 0x3b0   :  { %v2289_v6 = vpop.xlane.xlu0 %2288 }
 0x3b1   :  { %v2290_v25 = vrot.slane %v2289_v6, 4 }
 0x3b3   :  { %v2291_v42 = vadd.f32 %v2290_v25, %v2289_v6 }
 0x3b5   :  { %v2292_v43 = vrot.slane %v2291_v42, 2 }
 0x3b7   :  { %v2293_v44 = vadd.f32 %v2292_v43, %v2291_v42 }
 0x3b9   :  { %v2294_v46 = vrot.slane %v2293_v44, 1 }
 0x3bb   :  { %v2295_v47 = vadd.f32 %v2294_v46, %v2293_v44 }
 0x3bd   :  { %2656 = vpush %v2295_v47 }
 0x3ee   :  { %s2657_s29 = spop %2656 }
 0x3ef   :  { %2298 = sst [smem:[#allocation10]] %s2657_s29 }
 0x3f0   :  { %3206 = shalt.err (!%p3203_p6)
}
 0x3f1   :  { %s3224_s0 = smov [#allocation10]  }
 0x3f2   :  { %2316 = dma.smem_to_hbm %s3224_s0, 16, %s3397_s7, [#allocation5]  }
 0x3f3   :  { %3211 = dma.done.wait [#allocation4], 128  }
 0x3f4   :  { %3212 = vsyncadd [#allocation4], 4294967168 }
 0x3f5   :  { %3213 = dma.done.wait [#allocation5], 16  }
 0x3f6   :  { %3214 = vsyncadd [#allocation5], 4294967280 }
 0x3f7   :  { %2323 = sfence }
 0x3f8   :  { %2324 = vsyncpa [#allocation3], 1 }
 0x3f9   :  { %2325 = vsyncpa [#allocation7], 1 }
 0x3fa   :  { %2326 = vsyncpa [#allocation4], 1 }
 0x3fb   :  { %2327 = vsyncpa [#allocation5], 1 }

</bundles_post_ra>
